<compile_context>
chip_gen: v7x
topology: tpu7x:2x2x1
jax: 0.10.0
libtpu: 0.0.40
codegen_flags: <defaults>
</compile_context>

<pallas_src>
import functools

import jax
import jax.numpy as jnp
import numpy as np
from jax import lax
from jax.experimental import pallas as pl
from jax.experimental.pallas import tpu as pltpu


def _round_up(x, m):
    return ((x + m - 1) // m) * m


# ----------------------------- Pallas kernel --------------------------------
def rnn_layer_kernel(x_ref, wih_ref, whh_ref, bias_ref, h0_ref,
                     out_ref, hn_ref, xp_ref, h_ref,
                     *, act, t_chunk, n_chunks, seq_len):
    """One (direction, time-chunk) grid step of a vanilla RNN layer.

    x_ref:    (T, b_pad, in_pad)   current time chunk (time-major)
    wih_ref:  (in_pad, hid_pad)    W_ih^T for this direction
    whh_ref:  (hid_pad, hid_pad)   W_hh^T for this direction
    bias_ref: (1, hid_pad)         b_ih + b_hh for this direction
    h0_ref:   (b_pad, hid_pad)     initial hidden state for this direction
    out_ref:  (T, b_pad, hid_pad)  hidden states of this chunk / direction
    hn_ref:   (b_pad, hid_pad)     final hidden state of this direction
    xp_ref:   VMEM scratch (T, b_pad, hid_pad)  per-chunk pre-activations
    h_ref:    VMEM scratch (b_pad, hid_pad)     hidden state carried over chunks
    """
    d = pl.program_id(0)               # direction (0 = forward, 1 = reverse)
    i = pl.program_id(1)               # step along the (possibly reversed) walk
    T = t_chunk
    b, hid = h_ref.shape

    # (Re)load the carried hidden state at the first chunk of each direction.
    @pl.when(i == 0)
    def _():
        h_ref[...] = h0_ref[...]

    # Input projection for the whole chunk in one MXU matmul (+ bias).  Stored
    # in a dedicated scratch so the recurrent loop never reads back out_ref.
    xb = x_ref[...]
    din = xb.shape[-1]
    xp = jnp.dot(xb.reshape(T * b, din), wih_ref[...],
                 preferred_element_type=jnp.float32)
    xp_ref[...] = xp.reshape(T, b, hid) + bias_ref[...].reshape(1, 1, hid)

    whh = whh_ref[...]                             # hoisted once per chunk
    chunk = i + d * (n_chunks - 1 - 2 * i)         # original time-chunk index
    need_mask = (n_chunks * T != seq_len)          # static (seq padding only)

    def step(j, h):
        # within-chunk time index (flipped for the reverse direction)
        jj = j + d * (T - 1 - 2 * j)
        pre = xp_ref[jj] + jnp.dot(h, whh, preferred_element_type=jnp.float32)
        h_new = act(pre)
        if need_mask:                              # static branch
            t = chunk * T + jj
            h_new = jnp.where(t < seq_len, h_new, h)   # padded steps: carry h
        out_ref[jj] = h_new                        # store off the serial chain
        return h_new

    h_fin = lax.fori_loop(0, T, step, h_ref[...], unroll=min(8, T))
    h_ref[...] = h_fin
    hn_ref[...] = h_fin


def _vmem_limit_bytes(t_chunk, b_pad, in_pad, hid_pad):
    """Derive a safe scoped-VMEM limit from actual block sizes (+ headroom)."""
    f = 4  # f32
    x_blk = t_chunk * b_pad * in_pad * f
    out_blk = t_chunk * b_pad * hid_pad * f
    weights = (in_pad * hid_pad + hid_pad * hid_pad + hid_pad
               + b_pad * hid_pad) * f
    hn_blk = b_pad * hid_pad * f
    scratch = (t_chunk * b_pad * hid_pad + b_pad * hid_pad) * f
    total = 2 * (x_blk + out_blk + weights + hn_blk) + scratch   # double-buffered
    return int(min(max(total + (8 << 20), 16 << 20), 56 << 20))


def rnn_layer(x_pad, wih_s, whh_s, bias_s, h0_s, *, nonlinearity, seq_len,
              t_chunk):
    """x_pad: (seq_pad, b_pad, in_pad); weights stacked over directions."""
    seq_pad, b_pad, in_pad = x_pad.shape
    num_dirs, hid_pad, _ = whh_s.shape
    n_chunks = seq_pad // t_chunk
    act = jnp.tanh if nonlinearity == "tanh" else (lambda v: jnp.maximum(v, 0.0))
    kernel = functools.partial(rnn_layer_kernel, act=act, t_chunk=t_chunk,
                               n_chunks=n_chunks, seq_len=seq_len)

    def x_map(d, i):           # reverse direction walks the chunks backwards
        return (i + d * (n_chunks - 1 - 2 * i), 0, 0)

    def out_map(d, i):         # write straight into the dirs-concatenated output
        return (i + d * (n_chunks - 1 - 2 * i), 0, d)

    out, hn = pl.pallas_call(
        kernel,
        out_shape=(jax.ShapeDtypeStruct((seq_pad, b_pad, num_dirs * hid_pad),
                                        jnp.float32),
                   jax.ShapeDtypeStruct((num_dirs, b_pad, hid_pad),
                                        jnp.float32)),
        grid_spec=pltpu.PrefetchScalarGridSpec(
            num_scalar_prefetch=0,
            grid=(num_dirs, n_chunks),
            in_specs=[
                pl.BlockSpec((t_chunk, b_pad, in_pad), x_map),
                pl.BlockSpec((None, in_pad, hid_pad), lambda d, i: (d, 0, 0)),
                pl.BlockSpec((None, hid_pad, hid_pad), lambda d, i: (d, 0, 0)),
                pl.BlockSpec((None, 1, hid_pad), lambda d, i: (d, 0, 0)),
                pl.BlockSpec((None, b_pad, hid_pad), lambda d, i: (d, 0, 0)),
            ],
            out_specs=(
                pl.BlockSpec((t_chunk, b_pad, hid_pad), out_map),
                pl.BlockSpec((None, b_pad, hid_pad), lambda d, i: (d, 0, 0)),
            ),
            scratch_shapes=[pltpu.VMEM((t_chunk, b_pad, hid_pad), jnp.float32),
                            pltpu.VMEM((b_pad, hid_pad), jnp.float32)],
        ),
        compiler_params=pltpu.CompilerParams(
            # direction axis is independent (megacore-shardable); the seq-chunk
            # axis carries the recurrence -> arbitrary.
            dimension_semantics=("parallel", "arbitrary"),
            vmem_limit_bytes=_vmem_limit_bytes(t_chunk, b_pad, in_pad, hid_pad),
        ),
    )(x_pad, wih_s, whh_s, bias_s, h0_s)
    return out, hn


# ------------------------------ JAX glue -------------------------------------
def _pad_layer_params(params, l, *, num_dirs, input_size, hidden_size,
                      in0_pad, hid_pad):
    """Zero-pad + transpose-pack one layer's weights, stacked over directions."""
    in_pad = in0_pad if l == 0 else num_dirs * hid_pad
    wih_list, whh_list, bias_list = [], [], []
    for d in range(num_dirs):
        w_ih_t, w_hh_t, bias = params[(l, d)]     # (layer_in,hid),(hid,hid),(hid,)
        wih_p = jnp.zeros((in_pad, hid_pad), jnp.float32)
        if l == 0:
            wih_p = wih_p.at[:input_size, :hidden_size].set(w_ih_t)
        else:
            # previous layer's output lives in the padded fused layout:
            # dir0 features at [0:hid), dir1 features at [hid_pad:hid_pad+hid)
            for dd in range(num_dirs):
                rows = w_ih_t[dd * hidden_size:(dd + 1) * hidden_size]
                wih_p = wih_p.at[dd * hid_pad:dd * hid_pad + hidden_size,
                                 :hidden_size].set(rows)
        whh_p = jnp.zeros((hid_pad, hid_pad), jnp.float32
                          ).at[:hidden_size, :hidden_size].set(w_hh_t)
        bias_p = jnp.zeros((1, hid_pad), jnp.float32
                           ).at[0, :hidden_size].set(bias)
        wih_list.append(wih_p)
        whh_list.append(whh_p)
        bias_list.append(bias_p)
    return jnp.stack(wih_list), jnp.stack(whh_list), jnp.stack(bias_list)


def rnn_forward(x, h0, params, *, input_size, hidden_size, num_layers,
                bidirectional, batch_first, nonlinearity):
    """Mirrors torch.nn.RNN forward (Pallas path). Returns (output, h_n)."""
    if batch_first:
        x = jnp.transpose(x, (1, 0, 2))            # -> (seq, batch, input)
    seq, b, _ = x.shape
    num_dirs = 2 if bidirectional else 1

    hid_pad = _round_up(hidden_size, 128)          # lane-dense last dim
    b_pad = _round_up(b, 8)                        # full f32 sublanes
    in0_pad = _round_up(input_size, 128)
    t_chunk = max(1, min(seq, 128))                # bounded VMEM per chunk
    seq_pad = _round_up(seq, t_chunk)

    x_pad = jnp.zeros((seq_pad, b_pad, in0_pad), jnp.float32
                      ).at[:seq, :b, :input_size].set(x)
    h0_pad = jnp.zeros((num_layers * num_dirs, b_pad, hid_pad), jnp.float32
                       ).at[:, :b, :hidden_size].set(h0)

    hn_chunks = []
    layer_in = x_pad
    for l in range(num_layers):
        wih_s, whh_s, bias_s = _pad_layer_params(
            params, l, num_dirs=num_dirs, input_size=input_size,
            hidden_size=hidden_size, in0_pad=in0_pad, hid_pad=hid_pad)
        h0_l = h0_pad[l * num_dirs:(l + 1) * num_dirs]
        out, hn = rnn_layer(layer_in, wih_s, whh_s, bias_s, h0_l,
                            nonlinearity=nonlinearity, seq_len=seq,
                            t_chunk=t_chunk)
        hn_chunks.append(hn[:, :b, :hidden_size])
        layer_in = out                             # already in fused padded layout

    out4 = layer_in.reshape(seq_pad, b_pad, num_dirs, hid_pad)
    output = out4[:seq, :b, :, :hidden_size].reshape(seq, b,
                                                     num_dirs * hidden_size)
    h_n = jnp.concatenate(hn_chunks, axis=0)
    if batch_first:
        output = jnp.transpose(output, (1, 0, 2))  # -> (batch, seq, dirs*hidden)
    return output, h_n


def rnn_reference(x, h0, params, *, num_layers, bidirectional, batch_first,
                  nonlinearity):
    """Pure-JAX reference (no Pallas, unpadded) for correctness checking."""
    act = jnp.tanh if nonlinearity == "tanh" else (lambda v: jnp.maximum(v, 0.0))
    if batch_first:
        x = jnp.transpose(x, (1, 0, 2))
    num_dirs = 2 if bidirectional else 1
    h_n_list = []
    layer_in = x
    for l in range(num_layers):
        dir_outs = []
        for d in range(num_dirs):
            w_ih_t, w_hh_t, bias = params[(l, d)]
            h = h0[l * num_dirs + d]
            xi = layer_in[::-1] if d == 1 else layer_in
            outs = []
            for t in range(xi.shape[0]):
                h = act(xi[t] @ w_ih_t + h @ w_hh_t + bias)
                outs.append(h)
            out = jnp.stack(outs, axis=0)
            if d == 1:
                out = out[::-1]
            dir_outs.append(out)
            h_n_list.append(h)
        layer_in = (jnp.concatenate(dir_outs, axis=-1)
                    if num_dirs == 2 else dir_outs[0])
    output = layer_in
    h_n = jnp.stack(h_n_list, axis=0)
    if batch_first:
        output = jnp.transpose(output, (1, 0, 2))
    return output, h_n


def init_params(key, *, input_size, hidden_size, num_layers, bidirectional,
                has_bias):
    """torch.nn.RNN-style init: U(-1/sqrt(hidden), 1/sqrt(hidden))."""
    num_dirs = 2 if bidirectional else 1
    bound = 1.0 / np.sqrt(hidden_size)
    params = {}
    for l in range(num_layers):
        layer_in = input_size if l == 0 else hidden_size * num_dirs
        for d in range(num_dirs):
            key, k1, k2, k3, k4 = jax.random.split(key, 5)
            w_ih = jax.random.uniform(k1, (hidden_size, layer_in),
                                      minval=-bound, maxval=bound,
                                      dtype=jnp.float32)
            w_hh = jax.random.uniform(k2, (hidden_size, hidden_size),
                                      minval=-bound, maxval=bound,
                                      dtype=jnp.float32)
            if has_bias:
                b_ih = jax.random.uniform(k3, (hidden_size,), minval=-bound,
                                          maxval=bound, dtype=jnp.float32)
                b_hh = jax.random.uniform(k4, (hidden_size,), minval=-bound,
                                          maxval=bound, dtype=jnp.float32)
                bias = b_ih + b_hh
            else:
                bias = jnp.zeros((hidden_size,), jnp.float32)
            # store transposed weights so kernels do x @ W^T directly
            params[(l, d)] = (w_ih.T, w_hh.T, bias)
    return params, key


if __name__ == "__main__":
    # Module config (matches aten_rnn(...) constructor args)
    input_size = 16
    hidden_size = 32
    num_layers = 2
    has_bias = True
    bidirectional = True
    batch_first = True
    nonlinearity = "tanh"

    batch = 2
    seq = 8
    num_dirs = 2 if bidirectional else 1

    key = jax.random.PRNGKey(0)
    params, key = init_params(key, input_size=input_size,
                              hidden_size=hidden_size, num_layers=num_layers,
                              bidirectional=bidirectional, has_bias=has_bias)

    key, kx, kh = jax.random.split(key, 3)
    # batch_first=True -> input is (batch, seq, input_size)
    x = jax.random.normal(kx, (batch, seq, input_size), dtype=jnp.float32)
    h0 = jax.random.normal(kh, (num_layers * num_dirs, batch, hidden_size),
                           dtype=jnp.float32)

    output, h_n = rnn_forward(x, h0, params, input_size=input_size,
                              hidden_size=hidden_size, num_layers=num_layers,
                              bidirectional=bidirectional,
                              batch_first=batch_first,
                              nonlinearity=nonlinearity)
    output, h_n = jax.block_until_ready((output, h_n))

    # Sanity check against pure-JAX reference
    ref_out, ref_hn = rnn_reference(x, h0, params, num_layers=num_layers,
                                    bidirectional=bidirectional,
                                    batch_first=batch_first,
                                    nonlinearity=nonlinearity)
    np.testing.assert_allclose(np.asarray(output), np.asarray(ref_out),
                               rtol=1e-4, atol=1e-5)
    np.testing.assert_allclose(np.asarray(h_n), np.asarray(ref_hn),
                               rtol=1e-4, atol=1e-5)

    assert output.shape == (batch, seq, num_dirs * hidden_size)
    assert h_n.shape == (num_layers * num_dirs, batch, hidden_size)
    print("KERNEL_OK")
</pallas_src>

<mosaic_0001>
module attributes {stable_mosaic.version = 11 : i64} {
  func.func @rnn_layer_kernel(%arg0: i32, %arg1: i32, %arg2: memref<8x8x128xf32, #tpu.memory_space<vmem>>, %arg3: memref<1x128x128xf32, #tpu.memory_space<vmem>>, %arg4: memref<1x128x128xf32, #tpu.memory_space<vmem>>, %arg5: memref<1x1x128xf32, #tpu.memory_space<vmem>>, %arg6: memref<1x8x128xf32, #tpu.memory_space<vmem>>, %arg7: memref<8x8x128xf32, #tpu.memory_space<vmem>>, %arg8: memref<1x8x128xf32, #tpu.memory_space<vmem>>, %arg9: memref<8x8x128xf32, #tpu.memory_space<vmem>>, %arg10: memref<8x128xf32, #tpu.memory_space<vmem>>) attributes {dimension_semantics = [#tpu.dimension_semantics<parallel>, #tpu.dimension_semantics<arbitrary>], iteration_bounds = array<i64: 2, 1>, scalar_prefetch = 0 : i64, scratch_operands = 2 : i64, tpu.core_type = #tpu.core_type<tc>, window_params = [{transform_indices = @transform_0, window_bounds = array<i64: 8, 8, 128>}, {transform_indices = @transform_1, window_bounds = array<i64: 1, 128, 128>}, {transform_indices = @transform_2, window_bounds = array<i64: 1, 128, 128>}, {transform_indices = @transform_3, window_bounds = array<i64: 1, 1, 128>}, {transform_indices = @transform_4, window_bounds = array<i64: 1, 8, 128>}, {transform_indices = @transform_5, window_bounds = array<i64: 8, 8, 128>}, {transform_indices = @transform_6, window_bounds = array<i64: 1, 8, 128>}]} {
    %c0_i32 = arith.constant 0 : i32
    %0 = arith.cmpi eq, %arg1, %c0_i32 : i32
    %1 = arith.extui %0 : i1 to i32
    %c0_i32_0 = arith.constant 0 : i32
    %2 = arith.cmpi ne, %1, %c0_i32_0 : i32
    scf.if %2 {
      %c0_79 = arith.constant 0 : index
      %c0_80 = arith.constant 0 : index
      %c0_81 = arith.constant 0 : index
      %134 = vector.load %arg6[%c0_79, %c0_80, %c0_81] : memref<1x8x128xf32, #tpu.memory_space<vmem>>, vector<1x8x128xf32>
      %135 = vector.shape_cast %134 : vector<1x8x128xf32> to vector<8x128xf32>
      %c0_82 = arith.constant 0 : index
      %c0_83 = arith.constant 0 : index
      %136 = vector.load %arg10[%c0_82, %c0_83] : memref<8x128xf32, #tpu.memory_space<vmem>>, vector<8x128xf32>
      tpu.vector_store %arg10[%c0_82, %c0_83], %135 {strides = array<i32>} : memref<8x128xf32, #tpu.memory_space<vmem>>, vector<8x128xf32>,
    } else {
    }
    %c0 = arith.constant 0 : index
    %c0_1 = arith.constant 0 : index
    %c0_2 = arith.constant 0 : index
    %3 = vector.load %arg2[%c0, %c0_1, %c0_2] : memref<8x8x128xf32, #tpu.memory_space<vmem>>, vector<8x8x128xf32>
    %4 = vector.shape_cast %3 : vector<8x8x128xf32> to vector<64x128xf32>
    %c0_3 = arith.constant 0 : index
    %c0_4 = arith.constant 0 : index
    %c0_5 = arith.constant 0 : index
    %5 = vector.load %arg3[%c0_3, %c0_4, %c0_5] : memref<1x128x128xf32, #tpu.memory_space<vmem>>, vector<1x128x128xf32>
    %6 = vector.shape_cast %5 : vector<1x128x128xf32> to vector<128x128xf32>
    %cst = arith.constant dense<0.000000e+00> : vector<64x128xf32>
    %7 = tpu.matmul %4, %6, %cst {dimension_numbers = #tpu.dot_dimension_numbers<[1], [0], [0], [1], [0, 0, 1, 1], [], []>} : vector<64x128xf32>, vector<128x128xf32>, vector<64x128xf32> -> vector<64x128xf32>
    %8 = vector.shape_cast %7 : vector<64x128xf32> to vector<8x8x128xf32>
    %c0_6 = arith.constant 0 : index
    %c0_7 = arith.constant 0 : index
    %c0_8 = arith.constant 0 : index
    %9 = vector.load %arg5[%c0_6, %c0_7, %c0_8] : memref<1x1x128xf32, #tpu.memory_space<vmem>>, vector<1x1x128xf32>
    %10 = vector.shape_cast %9 : vector<1x1x128xf32> to vector<1x128xf32>
    %11 = vector.shape_cast %10 : vector<1x128xf32> to vector<1x1x128xf32>
    %12 = vector.broadcast %11 : vector<1x1x128xf32> to vector<8x8x128xf32>
    %13 = arith.addf %8, %12 : vector<8x8x128xf32>
    %c0_9 = arith.constant 0 : index
    %c0_10 = arith.constant 0 : index
    %c0_11 = arith.constant 0 : index
    %14 = vector.load %arg9[%c0_9, %c0_10, %c0_11] : memref<8x8x128xf32, #tpu.memory_space<vmem>>, vector<8x8x128xf32>
    tpu.vector_store %arg9[%c0_9, %c0_10, %c0_11], %13 {strides = array<i32>} : memref<8x8x128xf32, #tpu.memory_space<vmem>>, vector<8x8x128xf32>,
    %c0_12 = arith.constant 0 : index
    %c0_13 = arith.constant 0 : index
    %c0_14 = arith.constant 0 : index
    %15 = vector.load %arg4[%c0_12, %c0_13, %c0_14] : memref<1x128x128xf32, #tpu.memory_space<vmem>>, vector<1x128x128xf32>
    %16 = vector.shape_cast %15 : vector<1x128x128xf32> to vector<128x128xf32>
    %c0_15 = arith.constant 0 : index
    %c0_16 = arith.constant 0 : index
    %17 = vector.load %arg10[%c0_15, %c0_16] : memref<8x128xf32, #tpu.memory_space<vmem>>, vector<8x128xf32>
    %c0_i32_17 = arith.constant 0 : i32
    %c2_i32 = arith.constant 2 : i32
    %18 = arith.muli %c2_i32, %c0_i32_17 : i32
    %c7_i32 = arith.constant 7 : i32
    %19 = arith.subi %c7_i32, %18 : i32
    %20 = arith.muli %arg0, %19 : i32
    %21 = arith.addi %c0_i32_17, %20 : i32
    %22 = arith.index_cast %21 : i32 to index
    %c0_18 = arith.constant 0 : index
    %c0_19 = arith.constant 0 : index
    %23 = vector.load %arg9[%22, %c0_18, %c0_19] : memref<8x8x128xf32, #tpu.memory_space<vmem>>, vector<1x8x128xf32>
    %24 = vector.shape_cast %23 : vector<1x8x128xf32> to vector<8x128xf32>
    %cst_20 = arith.constant dense<0.000000e+00> : vector<8x128xf32>
    %25 = tpu.matmul %17, %16, %cst_20 {dimension_numbers = #tpu.dot_dimension_numbers<[1], [0], [0], [1], [0, 0, 1, 1], [], []>} : vector<8x128xf32>, vector<128x128xf32>, vector<8x128xf32> -> vector<8x128xf32>
    %26 = arith.addf %24, %25 : vector<8x128xf32>
    %27 = math.tanh %26 : vector<8x128xf32>
    %28 = arith.index_cast %21 : i32 to index
    %c0_21 = arith.constant 0 : index
    %c0_22 = arith.constant 0 : index
    %29 = vector.load %arg7[%28, %c0_21, %c0_22] : memref<8x8x128xf32, #tpu.memory_space<vmem>>, vector<1x8x128xf32>
    %30 = vector.shape_cast %29 : vector<1x8x128xf32> to vector<8x128xf32>
    %31 = vector.shape_cast %27 : vector<8x128xf32> to vector<1x8x128xf32>
    tpu.vector_store %arg7[%28, %c0_21, %c0_22], %31 {strides = array<i32>} : memref<8x8x128xf32, #tpu.memory_space<vmem>>, vector<1x8x128xf32>,
    %c1_i32 = arith.constant 1 : i32
    %c2_i32_23 = arith.constant 2 : i32
    %32 = arith.muli %c2_i32_23, %c1_i32 : i32
    %c7_i32_24 = arith.constant 7 : i32
    %33 = arith.subi %c7_i32_24, %32 : i32
    %34 = arith.muli %arg0, %33 : i32
    %35 = arith.addi %c1_i32, %34 : i32
    %36 = arith.index_cast %35 : i32 to index
    %c0_25 = arith.constant 0 : index
    %c0_26 = arith.constant 0 : index
    %37 = vector.load %arg9[%36, %c0_25, %c0_26] : memref<8x8x128xf32, #tpu.memory_space<vmem>>, vector<1x8x128xf32>
    %38 = vector.shape_cast %37 : vector<1x8x128xf32> to vector<8x128xf32>
    %cst_27 = arith.constant dense<0.000000e+00> : vector<8x128xf32>
    %39 = tpu.matmul %27, %16, %cst_27 {dimension_numbers = #tpu.dot_dimension_numbers<[1], [0], [0], [1], [0, 0, 1, 1], [], []>} : vector<8x128xf32>, vector<128x128xf32>, vector<8x128xf32> -> vector<8x128xf32>
    %40 = arith.addf %38, %39 : vector<8x128xf32>
    %41 = math.tanh %40 : vector<8x128xf32>
    %42 = arith.index_cast %35 : i32 to index
    %c0_28 = arith.constant 0 : index
    %c0_29 = arith.constant 0 : index
    %43 = vector.load %arg7[%42, %c0_28, %c0_29] : memref<8x8x128xf32, #tpu.memory_space<vmem>>, vector<1x8x128xf32>
    %44 = vector.shape_cast %43 : vector<1x8x128xf32> to vector<8x128xf32>
    %45 = vector.shape_cast %41 : vector<8x128xf32> to vector<1x8x128xf32>
    tpu.vector_store %arg7[%42, %c0_28, %c0_29], %45 {strides = array<i32>} : memref<8x8x128xf32, #tpu.memory_space<vmem>>, vector<1x8x128xf32>,
    %c2_i32_30 = arith.constant 2 : i32
    %c2_i32_31 = arith.constant 2 : i32
    %46 = arith.muli %c2_i32_31, %c2_i32_30 : i32
    %c7_i32_32 = arith.constant 7 : i32
    %47 = arith.subi %c7_i32_32, %46 : i32
    %48 = arith.muli %arg0, %47 : i32
    %49 = arith.addi %c2_i32_30, %48 : i32
    %50 = arith.index_cast %49 : i32 to index
    %c0_33 = arith.constant 0 : index
    %c0_34 = arith.constant 0 : index
    %51 = vector.load %arg9[%50, %c0_33, %c0_34] : memref<8x8x128xf32, #tpu.memory_space<vmem>>, vector<1x8x128xf32>
    %52 = vector.shape_cast %51 : vector<1x8x128xf32> to vector<8x128xf32>
    %cst_35 = arith.constant dense<0.000000e+00> : vector<8x128xf32>
    %53 = tpu.matmul %41, %16, %cst_35 {dimension_numbers = #tpu.dot_dimension_numbers<[1], [0], [0], [1], [0, 0, 1, 1], [], []>} : vector<8x128xf32>, vector<128x128xf32>, vector<8x128xf32> -> vector<8x128xf32>
    %54 = arith.addf %52, %53 : vector<8x128xf32>
    %55 = math.tanh %54 : vector<8x128xf32>
    %56 = arith.index_cast %49 : i32 to index
    %c0_36 = arith.constant 0 : index
    %c0_37 = arith.constant 0 : index
    %57 = vector.load %arg7[%56, %c0_36, %c0_37] : memref<8x8x128xf32, #tpu.memory_space<vmem>>, vector<1x8x128xf32>
    %58 = vector.shape_cast %57 : vector<1x8x128xf32> to vector<8x128xf32>
    %59 = vector.shape_cast %55 : vector<8x128xf32> to vector<1x8x128xf32>
    tpu.vector_store %arg7[%56, %c0_36, %c0_37], %59 {strides = array<i32>} : memref<8x8x128xf32, #tpu.memory_space<vmem>>, vector<1x8x128xf32>,
    %c3_i32 = arith.constant 3 : i32
    %c2_i32_38 = arith.constant 2 : i32
    %60 = arith.muli %c2_i32_38, %c3_i32 : i32
    %c7_i32_39 = arith.constant 7 : i32
    %61 = arith.subi %c7_i32_39, %60 : i32
    %62 = arith.muli %arg0, %61 : i32
    %63 = arith.addi %c3_i32, %62 : i32
    %64 = arith.index_cast %63 : i32 to index
    %c0_40 = arith.constant 0 : index
    %c0_41 = arith.constant 0 : index
    %65 = vector.load %arg9[%64, %c0_40, %c0_41] : memref<8x8x128xf32, #tpu.memory_space<vmem>>, vector<1x8x128xf32>
    %66 = vector.shape_cast %65 : vector<1x8x128xf32> to vector<8x128xf32>
    %cst_42 = arith.constant dense<0.000000e+00> : vector<8x128xf32>
    %67 = tpu.matmul %55, %16, %cst_42 {dimension_numbers = #tpu.dot_dimension_numbers<[1], [0], [0], [1], [0, 0, 1, 1], [], []>} : vector<8x128xf32>, vector<128x128xf32>, vector<8x128xf32> -> vector<8x128xf32>
    %68 = arith.addf %66, %67 : vector<8x128xf32>
    %69 = math.tanh %68 : vector<8x128xf32>
    %70 = arith.index_cast %63 : i32 to index
    %c0_43 = arith.constant 0 : index
    %c0_44 = arith.constant 0 : index
    %71 = vector.load %arg7[%70, %c0_43, %c0_44] : memref<8x8x128xf32, #tpu.memory_space<vmem>>, vector<1x8x128xf32>
    %72 = vector.shape_cast %71 : vector<1x8x128xf32> to vector<8x128xf32>
    %73 = vector.shape_cast %69 : vector<8x128xf32> to vector<1x8x128xf32>
    tpu.vector_store %arg7[%70, %c0_43, %c0_44], %73 {strides = array<i32>} : memref<8x8x128xf32, #tpu.memory_space<vmem>>, vector<1x8x128xf32>,
    %c4_i32 = arith.constant 4 : i32
    %c2_i32_45 = arith.constant 2 : i32
    %74 = arith.muli %c2_i32_45, %c4_i32 : i32
    %c7_i32_46 = arith.constant 7 : i32
    %75 = arith.subi %c7_i32_46, %74 : i32
    %76 = arith.muli %arg0, %75 : i32
    %77 = arith.addi %c4_i32, %76 : i32
    %78 = arith.index_cast %77 : i32 to index
    %c0_47 = arith.constant 0 : index
    %c0_48 = arith.constant 0 : index
    %79 = vector.load %arg9[%78, %c0_47, %c0_48] : memref<8x8x128xf32, #tpu.memory_space<vmem>>, vector<1x8x128xf32>
    %80 = vector.shape_cast %79 : vector<1x8x128xf32> to vector<8x128xf32>
    %cst_49 = arith.constant dense<0.000000e+00> : vector<8x128xf32>
    %81 = tpu.matmul %69, %16, %cst_49 {dimension_numbers = #tpu.dot_dimension_numbers<[1], [0], [0], [1], [0, 0, 1, 1], [], []>} : vector<8x128xf32>, vector<128x128xf32>, vector<8x128xf32> -> vector<8x128xf32>
    %82 = arith.addf %80, %81 : vector<8x128xf32>
    %83 = math.tanh %82 : vector<8x128xf32>
    %84 = arith.index_cast %77 : i32 to index
    %c0_50 = arith.constant 0 : index
    %c0_51 = arith.constant 0 : index
    %85 = vector.load %arg7[%84, %c0_50, %c0_51] : memref<8x8x128xf32, #tpu.memory_space<vmem>>, vector<1x8x128xf32>
    %86 = vector.shape_cast %85 : vector<1x8x128xf32> to vector<8x128xf32>
    %87 = vector.shape_cast %83 : vector<8x128xf32> to vector<1x8x128xf32>
    tpu.vector_store %arg7[%84, %c0_50, %c0_51], %87 {strides = array<i32>} : memref<8x8x128xf32, #tpu.memory_space<vmem>>, vector<1x8x128xf32>,
    %c5_i32 = arith.constant 5 : i32
    %c2_i32_52 = arith.constant 2 : i32
    %88 = arith.muli %c2_i32_52, %c5_i32 : i32
    %c7_i32_53 = arith.constant 7 : i32
    %89 = arith.subi %c7_i32_53, %88 : i32
    %90 = arith.muli %arg0, %89 : i32
    %91 = arith.addi %c5_i32, %90 : i32
    %92 = arith.index_cast %91 : i32 to index
    %c0_54 = arith.constant 0 : index
    %c0_55 = arith.constant 0 : index
    %93 = vector.load %arg9[%92, %c0_54, %c0_55] : memref<8x8x128xf32, #tpu.memory_space<vmem>>, vector<1x8x128xf32>
    %94 = vector.shape_cast %93 : vector<1x8x128xf32> to vector<8x128xf32>
    %cst_56 = arith.constant dense<0.000000e+00> : vector<8x128xf32>
    %95 = tpu.matmul %83, %16, %cst_56 {dimension_numbers = #tpu.dot_dimension_numbers<[1], [0], [0], [1], [0, 0, 1, 1], [], []>} : vector<8x128xf32>, vector<128x128xf32>, vector<8x128xf32> -> vector<8x128xf32>
    %96 = arith.addf %94, %95 : vector<8x128xf32>
    %97 = math.tanh %96 : vector<8x128xf32>
    %98 = arith.index_cast %91 : i32 to index
    %c0_57 = arith.constant 0 : index
    %c0_58 = arith.constant 0 : index
    %99 = vector.load %arg7[%98, %c0_57, %c0_58] : memref<8x8x128xf32, #tpu.memory_space<vmem>>, vector<1x8x128xf32>
    %100 = vector.shape_cast %99 : vector<1x8x128xf32> to vector<8x128xf32>
    %101 = vector.shape_cast %97 : vector<8x128xf32> to vector<1x8x128xf32>
    tpu.vector_store %arg7[%98, %c0_57, %c0_58], %101 {strides = array<i32>} : memref<8x8x128xf32, #tpu.memory_space<vmem>>, vector<1x8x128xf32>,
    %c6_i32 = arith.constant 6 : i32
    %c2_i32_59 = arith.constant 2 : i32
    %102 = arith.muli %c2_i32_59, %c6_i32 : i32
    %c7_i32_60 = arith.constant 7 : i32
    %103 = arith.subi %c7_i32_60, %102 : i32
    %104 = arith.muli %arg0, %103 : i32
    %105 = arith.addi %c6_i32, %104 : i32
    %106 = arith.index_cast %105 : i32 to index
    %c0_61 = arith.constant 0 : index
    %c0_62 = arith.constant 0 : index
    %107 = vector.load %arg9[%106, %c0_61, %c0_62] : memref<8x8x128xf32, #tpu.memory_space<vmem>>, vector<1x8x128xf32>
    %108 = vector.shape_cast %107 : vector<1x8x128xf32> to vector<8x128xf32>
    %cst_63 = arith.constant dense<0.000000e+00> : vector<8x128xf32>
    %109 = tpu.matmul %97, %16, %cst_63 {dimension_numbers = #tpu.dot_dimension_numbers<[1], [0], [0], [1], [0, 0, 1, 1], [], []>} : vector<8x128xf32>, vector<128x128xf32>, vector<8x128xf32> -> vector<8x128xf32>
    %110 = arith.addf %108, %109 : vector<8x128xf32>
    %111 = math.tanh %110 : vector<8x128xf32>
    %112 = arith.index_cast %105 : i32 to index
    %c0_64 = arith.constant 0 : index
    %c0_65 = arith.constant 0 : index
    %113 = vector.load %arg7[%112, %c0_64, %c0_65] : memref<8x8x128xf32, #tpu.memory_space<vmem>>, vector<1x8x128xf32>
    %114 = vector.shape_cast %113 : vector<1x8x128xf32> to vector<8x128xf32>
    %115 = vector.shape_cast %111 : vector<8x128xf32> to vector<1x8x128xf32>
    tpu.vector_store %arg7[%112, %c0_64, %c0_65], %115 {strides = array<i32>} : memref<8x8x128xf32, #tpu.memory_space<vmem>>, vector<1x8x128xf32>,
    %c7_i32_66 = arith.constant 7 : i32
    %c2_i32_67 = arith.constant 2 : i32
    %116 = arith.muli %c2_i32_67, %c7_i32_66 : i32
    %c7_i32_68 = arith.constant 7 : i32
    %117 = arith.subi %c7_i32_68, %116 : i32
    %118 = arith.muli %arg0, %117 : i32
    %119 = arith.addi %c7_i32_66, %118 : i32
    %120 = arith.index_cast %119 : i32 to index
    %c0_69 = arith.constant 0 : index
    %c0_70 = arith.constant 0 : index
    %121 = vector.load %arg9[%120, %c0_69, %c0_70] : memref<8x8x128xf32, #tpu.memory_space<vmem>>, vector<1x8x128xf32>
    %122 = vector.shape_cast %121 : vector<1x8x128xf32> to vector<8x128xf32>
    %cst_71 = arith.constant dense<0.000000e+00> : vector<8x128xf32>
    %123 = tpu.matmul %111, %16, %cst_71 {dimension_numbers = #tpu.dot_dimension_numbers<[1], [0], [0], [1], [0, 0, 1, 1], [], []>} : vector<8x128xf32>, vector<128x128xf32>, vector<8x128xf32> -> vector<8x128xf32>
    %124 = arith.addf %122, %123 : vector<8x128xf32>
    %125 = math.tanh %124 : vector<8x128xf32>
    %126 = arith.index_cast %119 : i32 to index
    %c0_72 = arith.constant 0 : index
    %c0_73 = arith.constant 0 : index
    %127 = vector.load %arg7[%126, %c0_72, %c0_73] : memref<8x8x128xf32, #tpu.memory_space<vmem>>, vector<1x8x128xf32>
    %128 = vector.shape_cast %127 : vector<1x8x128xf32> to vector<8x128xf32>
    %129 = vector.shape_cast %125 : vector<8x128xf32> to vector<1x8x128xf32>
    tpu.vector_store %arg7[%126, %c0_72, %c0_73], %129 {strides = array<i32>} : memref<8x8x128xf32, #tpu.memory_space<vmem>>, vector<1x8x128xf32>,
    %c8_i32 = arith.constant 8 : i32
    %c0_74 = arith.constant 0 : index
    %c0_75 = arith.constant 0 : index
    %130 = vector.load %arg10[%c0_74, %c0_75] : memref<8x128xf32, #tpu.memory_space<vmem>>, vector<8x128xf32>
    tpu.vector_store %arg10[%c0_74, %c0_75], %125 {strides = array<i32>} : memref<8x128xf32, #tpu.memory_space<vmem>>, vector<8x128xf32>,
    %c0_76 = arith.constant 0 : index
    %c0_77 = arith.constant 0 : index
    %c0_78 = arith.constant 0 : index
    %131 = vector.load %arg8[%c0_76, %c0_77, %c0_78] : memref<1x8x128xf32, #tpu.memory_space<vmem>>, vector<1x8x128xf32>
    %132 = vector.shape_cast %131 : vector<1x8x128xf32> to vector<8x128xf32>
    %133 = vector.shape_cast %125 : vector<8x128xf32> to vector<1x8x128xf32>
    tpu.vector_store %arg8[%c0_76, %c0_77, %c0_78], %133 {strides = array<i32>} : memref<1x8x128xf32, #tpu.memory_space<vmem>>, vector<1x8x128xf32>,
    return
  }
  func.func @transform_0(%arg0: i32, %arg1: i32) -> (i32, i32, i32) {
    %c2_i32 = arith.constant 2 : i32
    %0 = arith.muli %c2_i32, %arg1 : i32
    %c0_i32 = arith.constant 0 : i32
    %1 = arith.subi %c0_i32, %0 : i32
    %2 = arith.muli %arg0, %1 : i32
    %3 = arith.addi %arg1, %2 : i32
    %c0_i32_0 = arith.constant 0 : i32
    %c0_i32_1 = arith.constant 0 : i32
    %c0_i32_2 = arith.constant 0 : i32
    return %3, %c0_i32_0, %c0_i32_1 : i32, i32, i32
  }
  func.func @transform_1(%arg0: i32, %arg1: i32) -> (i32, i32, i32) {
    %c0_i32 = arith.constant 0 : i32
    %c0_i32_0 = arith.constant 0 : i32
    %c0_i32_1 = arith.constant 0 : i32
    return %arg0, %c0_i32, %c0_i32_0 : i32, i32, i32
  }
  func.func @transform_2(%arg0: i32, %arg1: i32) -> (i32, i32, i32) {
    %c0_i32 = arith.constant 0 : i32
    %c0_i32_0 = arith.constant 0 : i32
    %c0_i32_1 = arith.constant 0 : i32
    return %arg0, %c0_i32, %c0_i32_0 : i32, i32, i32
  }
  func.func @transform_3(%arg0: i32, %arg1: i32) -> (i32, i32, i32) {
    %c0_i32 = arith.constant 0 : i32
    %c0_i32_0 = arith.constant 0 : i32
    %c0_i32_1 = arith.constant 0 : i32
    return %arg0, %c0_i32, %c0_i32_0 : i32, i32, i32
  }
  func.func @transform_4(%arg0: i32, %arg1: i32) -> (i32, i32, i32) {
    %c0_i32 = arith.constant 0 : i32
    %c0_i32_0 = arith.constant 0 : i32
    %c0_i32_1 = arith.constant 0 : i32
    return %arg0, %c0_i32, %c0_i32_0 : i32, i32, i32
  }
  func.func @transform_5(%arg0: i32, %arg1: i32) -> (i32, i32, i32) {
    %c2_i32 = arith.constant 2 : i32
    %0 = arith.muli %c2_i32, %arg1 : i32
    %c0_i32 = arith.constant 0 : i32
    %1 = arith.subi %c0_i32, %0 : i32
    %2 = arith.muli %arg0, %1 : i32
    %3 = arith.addi %arg1, %2 : i32
    %c0_i32_0 = arith.constant 0 : i32
    %c0_i32_1 = arith.constant 0 : i32
    return %3, %c0_i32_0, %arg0 : i32, i32, i32
  }
  func.func @transform_6(%arg0: i32, %arg1: i32) -> (i32, i32, i32) {
    %c0_i32 = arith.constant 0 : i32
    %c0_i32_0 = arith.constant 0 : i32
    %c0_i32_1 = arith.constant 0 : i32
    return %arg0, %c0_i32, %c0_i32_0 : i32, i32, i32
  }
}

</mosaic_0001>

<bundles_post_ra>
// kernel: tpu_custom_call.1
= control target key start
LH: loop header
LB: loop body
LE: loop exit
PB: predicated region body
PF: predicated region fallthrough
CT: control target
= control target key end

     0   :  { %s3270_s0 = inlined_call_operand.hbm [shape: f32[8,8,128], index: 0, kind: input, shape index: {}]   ;;  %s3271_s1 = inlined_call_operand.hbm [shape: f32[2,128,128], index: 1, kind: input, shape index: {}]   ;;  %s3272_s2 = inlined_call_operand.hbm [shape: f32[2,128,128], index: 2, kind: input, shape index: {}]   ;;  %s3273_s3 = inlined_call_operand.vmem [shape: f32[2,1,128], index: 3, kind: input, shape index: {}]   ;;  %s3274_s4 = inlined_call_operand.hbm [shape: f32[2,8,128], index: 4, kind: input, shape index: {}]   ;;  %s3275_s5 = inlined_call_operand.hbm [shape: f32[8,8,256], index: 5, kind: output, shape index: {0}]   ;;  %s3276_s6 = inlined_call_operand.hbm [shape: f32[2,8,128], index: 6, kind: output, shape index: {1}]  }
   0x1   :  { %3291 = sst [smem:[#allocation24_spill]] %s3271_s1 }
   0x2   :  { %3292 = sst [smem:[#allocation25_spill]] %s3272_s2 }
   0x3   :  { %12 = vsyncpa [#allocation5], 0 }
   0x4   :  { %14 = vsyncpa [#allocation5 + $0x1], 0 }
   0x5   :  { %15 = vsyncpa [#allocation8], 0 }
   0x6   :  { %17 = vsyncpa [#allocation8 + $0x1], 0 }
   0x7   :  { %18 = vsyncpa [#allocation11], 0 }
   0x8   :  { %20 = vsyncpa [#allocation11 + $0x1], 0 }
   0x9   :  { %21 = vsyncpa [#allocation6], 0 }
   0xa   :  { %23 = vsyncpa [#allocation6 + $0x1], 0 }
   0xb   :  { %24 = vsyncpa [#allocation14], 0 }
   0xc   :  { %26 = vsyncpa [#allocation14 + $0x1], 0  ;;  %s2708_s21 = smov 0   ;;  %s2710_s22 = smov 0  }
   0xd   :  { %s2712_s23 = smov 0   ;;  %s2714_s24 = smov 0  }
   0xe   :  { %s2716_s25 = smov 0   ;;  %s2718_s26 = smov 0  }
   0xf LB: > { %3293 = sst [smem:[#allocation20_spill]] %s2645_s23  ;;  %s2739_s27 = sadd.s32 4294967295, %s2657_s26   ;;  %s2657_s26 = sphi %s2718_s26, %s32_s26   ;;  %s2653_s25 = sphi %s2716_s25, %s3327_s25   ;;  %s2649_s24 = sphi %s2714_s24, %s3326_s24   ;;  %s2645_s23 = sphi %s2712_s23, %s3322_s23   ;;  %s2641_s22 = sphi %s2710_s22, %s3325_s22   ;;  %s2637_s21 = sphi %s2708_s21, %s3324_s21  }
  0x10   : > { %s1544_s28 = sadd.s32 4294967294, %s2657_s26   ;;  %s44_s29 = sadd.s32 1, %s2653_s25 }
  0x11   : > { %s85_s30 = sadd.s32 1, %s2645_s23  ;;  %p46_p0 = scmp.ge.s32.totalorder %s44_s29, 2 }
  0x12   : > { %p92_p1 = scmp.ne.s32.totalorder %s2645_s23, %s2641_s22  ;;  %p3282_p2 = scmp.eq.s32.totalorder %s2657_s26, 0 }
  0x13   : > { %p98_p3 = scmp.ne.s32.totalorder %s2641_s22, %s2637_s21  ;;  %s3329_s29 = smov (%p46_p0, %s44_s29), 0 }
  0x14   : > { %3294 = sst [smem:[#allocation21_spill]] %s3329_s29  ;;  %p2753_p4 = por %p3282_p2, %p92_p1 }
  0x15   : > { %p3280_p5 = scmp.eq.s32.totalorder %s2739_s27, 0  ;;  %s82_s8 = ssub.s32 %s2653_s25, %s3329_s29 }
  0x16   : > { %p210_p6 = scmp.eq.s32.totalorder %s2739_s27, 1  ;;  %p83_p7 = scmp.eq.s32.totalorder %s82_s8, 0 }
  0x17   : > { %p2763_p8 = por %p3280_p5, %p98_p3  ;;  %p216_p10 = scmp.eq.s32.totalorder %s1544_s28, 1 }
  0x18   : > { %p2767_p9 = por %p210_p6, %p92_p1  ;;  %p3281_p13 = scmp.lt.s32.totalorder %s2657_s26, 2 }
  0x19   : > { %s3296_s9 = scalar_select %p2763_p8, 1, 0 }
  0x1a   : > { %s3297_s10 = scalar_select %p2767_p9, 1, 0 }
  0x1b   : > { %s2772_s11 = scalar_select %p83_p7, %s2645_s23, %s85_s30  }
  0x1c   : > { %p2774_p11 = por %p216_p10, %p98_p3  ;;  %s287_s13 = sand.u32 1, %s2657_s26  }
  0x1d   : > { %3298 = sst [smem:[#allocation22_spill]] %s2772_s11  ;;  %s2782_s14 = sand.u32 1, %s2645_s23  }
  0x1e   : > { %s3299_s12 = scalar_select %p2774_p11, 1, 0 }
  0x1f   : > { %s1548_s15 = sshll.u32 %s2782_s14, 7  ;;  %s1596_s16 = sshll.u32 %s2653_s25, 11 }
  0x20   : > { %3300 = sst [smem:[#allocation23_spill]] %s3299_s12  ;;  %s3301_s1 = sld [smem:[#allocation24_spill]] }
  0x21   : > { %s291_s20 = scalar_lea.vmem [#allocation7], %s1548_s15  ;;  %p2797_p0 = pnand %p3281_p13, %p2753_p4 }
  0x22   : > { %s298_s28 = sshll.u32 %s291_s20, 4  ;;  %s3303_s2 = sld [smem:[#allocation25_spill]]  ;;  %s2791_s28 = int_to_ptr.vmem [resolvable:$true] %s298_s28 }
  0x23   : > { %s3302_s30 = scalar_select %p2797_p0, 1, 0 }
  0x24   : > { %s2806_s18 = scalar_lea.vmem [#allocation9], %s1548_s15  ;;  %s2809_s20 = scalar_lea.sflag [#allocation8], %s287_s13 }
  0x25   : > { %s319_s11 = sshll.u32 %s2806_s18, 4  ;;  %p2815_p3 = pneg %p2797_p0  ;;  %s2844_s11 = int_to_ptr.vmem [resolvable:$true] %s319_s11 }
  0x26   : > { %s2789_s19 = scalar_lea.hbm %s3301_s1, %s1596_s16  ;;  %s2422_s15 = scalar_lea.hbm %s3301_s1, 4096 }
  0x27   : > { %s2417_s23 = scalar_lea.hbm %s2789_s19, 2048  ;;  %p2423_p7 = scmp.lt.u32.totalorder %s2789_s19, %s3301_s1 }
  0x28   : > { %s2804_s17 = scalar_lea.hbm %s3303_s2, %s1596_s16  ;;  %p2418_p1 = scmp.ne.s32.totalorder %s2789_s19, %s2417_s23 }
  0x29   : > { %p2424_p10 = scmp.lt.u32.totalorder %s2422_s15, %s2417_s23  ;;  %p2426_p5 = scmp.lt.u32.totalorder %s2417_s23, %s2789_s19 }
  0x2a   : > { %p2420_p4 = pnand %p2815_p3, %p2418_p1 }
  0x2b   : > { %p2425_p12 = por %p2424_p10, %p2423_p7 }
  0x2c   : > { %p2421_p6 = pneg %p2420_p4 }
  0x2d   : > { %p2427_p13 = por %p2426_p5, %p2425_p12 }
  0x2f   : > { %p2428_p2 = pnand %p2427_p13, %p2421_p6 }
  0x31   : > { %2431 = shalt.err (!%p2428_p2)
}
  0x32   : > { %s2432_s13 = scalar_lea.vmem %s2791_s28, 2048  ;;  %s2659_s29 = smov [#allocation7]  }
  0x33   : > { %p2433_p1 = scmp.ne.s32.totalorder %s2791_s28, %s2432_s13  ;;  %s2437_s16 = sshll.u32 %s2659_s29, 4  ;;  %s2438_s16 = int_to_ptr.vmem [resolvable:$false] %s2437_s16 }
  0x34   : > { %s2439_s12 = scalar_lea.vmem %s2438_s16, 4096  ;;  %p2440_p9 = scmp.lt.s32.totalorder %s2791_s28, %s2438_s16 }
  0x35   : > { %p2435_p4 = pnand %p2433_p1, %p2815_p3  ;;  %p2441_p8 = scmp.lt.s32.totalorder %s2439_s12, %s2432_s13 }
  0x37   : > { %p2436_p11 = pneg %p2435_p4  ;;  %p2442_p7 = por %p2441_p8, %p2440_p9 }
  0x39   : > { %p2443_p10 = pnand %p2442_p7, %p2436_p11 }
  0x3b   : > { %2446 = shalt.err (!%p2443_p10)
}
  0x3c   : > { %s3285_s23 = smov 128   ;;  %s3287_s15 = smov 8  }
  0x3d   : > { %2326 = dma.hbm_to_vmem [thread:$0]  (!%p2797_p0), %s2789_s19, 2048, %s2791_s28, %s2809_s20, %s3285_s23, %s3285_s23, %s3287_s15  }
  0x3e   : > { %p1556_p2 = scmp.ge.s32.totalorder %s2657_s26, 1  ;;  %p351_p5 = scmp.lt.s32.totalorder %s2657_s26, 3 }
  0x3f   : > { %s2662_s13 = smov [#allocation4]   ;;  %p3306_p9 = scmp.eq.s32.totalorder %s2657_s26, 0 }
  0x40   : > { %p2848_p8 = pnand %p1556_p2, %p351_p5  ;;  %s277_s29 = sshll.u32 %s2662_s13, 4  ;;  %s2852_s29 = int_to_ptr.vmem [resolvable:$true] %s277_s29 }
  0x41   : > { %p3307_p11 = scmp.lt.s32.totalorder %s2657_s26, 2  ;;  %s2447_s19 = scalar_lea.hbm %s2804_s17, 2048 }
  0x42   : > { %s3305_s8 = scalar_select %p2848_p8, 1, 0 }
  0x43   : > { %p2858_p12 = pnand %p3307_p11, %p3306_p9  ;;  %p2448_p13 = scmp.ne.s32.totalorder %s2804_s17, %s2447_s19 }
  0x44   : > { %s2452_s12 = scalar_lea.hbm %s3303_s2, 4096  ;;  %p2453_p4 = scmp.lt.u32.totalorder %s2804_s17, %s3303_s2 }
  0x45   : > { %s3308_s16 = scalar_select %p2858_p12, 1, 0 }
  0x46   : > { %p2450_p6 = pnand %p2448_p13, %p2815_p3  ;;  %p2454_p7 = scmp.lt.u32.totalorder %s2452_s12, %s2447_s19 }
  0x47   : > { %p2456_p2 = scmp.lt.u32.totalorder %s2447_s19, %s2804_s17 }
  0x48   : > { %p2451_p1 = pneg %p2450_p6  ;;  %p2455_p10 = por %p2454_p7, %p2453_p4 }
  0x4a   : > { %p2457_p5 = por %p2456_p2, %p2455_p10 }
  0x4c   : > { %p2458_p9 = pnand %p2457_p5, %p2451_p1 }
  0x4e   : > { %2461 = shalt.err (!%p2458_p9)
}
  0x4f   : > { %s2462_s13 = scalar_lea.vmem %s2844_s11, 2048  ;;  %s2663_s28 = smov [#allocation9]  }
  0x50   : > { %p2463_p11 = scmp.ne.s32.totalorder %s2844_s11, %s2462_s13  ;;  %s2467_s18 = sshll.u32 %s2663_s28, 4  ;;  %s2468_s18 = int_to_ptr.vmem [resolvable:$false] %s2467_s18 }
  0x51   : > { %s2469_s23 = scalar_lea.vmem %s2468_s18, 4096  ;;  %p2470_p8 = scmp.lt.s32.totalorder %s2844_s11, %s2468_s18 }
  0x52   : > { %p2465_p13 = pnand %p2463_p11, %p2815_p3  ;;  %p2471_p12 = scmp.lt.s32.totalorder %s2469_s23, %s2462_s13 }
  0x54   : > { %p2466_p6 = pneg %p2465_p13  ;;  %p2472_p4 = por %p2471_p12, %p2470_p8 }
  0x56   : > { %p2473_p7 = pnand %p2472_p4, %p2466_p6 }
  0x58   : > { %2476 = shalt.err (!%p2473_p7)
}
  0x59   : > { %s3309_s15 = smov 8   ;;  %s3310_s19 = smov 128  }
  0x5a   : > { %2329 = dma.hbm_to_vmem [thread:$0]  (!%p2797_p0), %s2804_s17, 2048, %s2844_s11, %s2809_s20, %s3310_s19, %s3310_s19, %s3309_s15  }
  0x5b   : > { %s2477_s28 = scalar_lea.hbm %s3270_s0, 1024  ;;  %p3311_p12 = scmp.ne.s32.totalorder %s3308_s16, 0 }
  0x5c   : > { %p2478_p8 = scmp.ne.s32.totalorder %s3270_s0, %s2477_s28  ;;  %p2484_p5 = scmp.lt.u32.totalorder %s2477_s28, %s3270_s0 }
  0x5d   : > { %p2479_p1 = pneg %p3311_p12 }
  0x5f   : > { %p2480_p10 = pnand %p2479_p1, %p2478_p8 }
  0x61   : > { %p2481_p2 = pneg %p2480_p10 }
  0x63   : > { %p2486_p9 = pnand %p2484_p5, %p2481_p2 }
  0x65   : > { %2489 = shalt.err (!%p2486_p9)
}
  0x66   : > { %s2490_s1 = scalar_lea.vmem %s2852_s29, 1024  ;;  %s2497_s2 = scalar_lea.vmem %s2852_s29, 2048 }
  0x67   : > { %p2491_p11 = scmp.ne.s32.totalorder %s2852_s29, %s2490_s1  ;;  %p2498_p4 = scmp.lt.s32.totalorder %s2852_s29, %s2852_s29 }
  0x68   : > { %p2499_p7 = scmp.lt.s32.totalorder %s2497_s2, %s2490_s1 }
  0x69   : > { %p2493_p13 = pnand %p2491_p11, %p2479_p1 }
  0x6a   : > { %p2500_p8 = por %p2499_p7, %p2498_p4 }
  0x6b   : > { %p2494_p6 = pneg %p2493_p13 }
  0x6d   : > { %p2501_p10 = pnand %p2500_p8, %p2494_p6 }
  0x6f   : > { %2504 = shalt.err (!%p2501_p10)
}
  0x70   : > { %2323 = dma.hbm_to_vmem [thread:$0]  (!%p3311_p12), %s3270_s0, 1024, %s2852_s29, [#allocation5], %s3310_s19, %s3310_s19, %s3309_s15  }
  0x71   : > { %s1554_s20 = sshll.u32 %s2782_s14, 3  ;;  %s1555_s12 = sshll.u32 %s2653_s25, 7 }
  0x72   : > { %s2917_s13 = scalar_lea.hbm %s3274_s4, %s1555_s12  ;;  %s339_s16 = scalar_lea.vmem [#allocation10], %s1554_s20 }
  0x73   : > { %s346_s23 = sshll.u32 %s339_s16, 4  ;;  %s336_s1 = scalar_lea.sflag [#allocation11], %s2782_s14  ;;  %s347_s23 = int_to_ptr.vmem [resolvable:$true] %s346_s23 }
  0x74   : > { %s2505_s2 = scalar_lea.hbm %s2917_s13, 128  ;;  %s2510_s19 = scalar_lea.hbm %s3274_s4, 256 }
  0x75   : > { %p2506_p1 = scmp.ne.s32.totalorder %s2917_s13, %s2505_s2  ;;  %p2511_p5 = scmp.lt.u32.totalorder %s2917_s13, %s3274_s4 }
  0x76   : > { %p2512_p9 = scmp.lt.u32.totalorder %s2510_s19, %s2505_s2  ;;  %p2514_p13 = scmp.lt.u32.totalorder %s2505_s2, %s2917_s13 }
  0x77   : > { %p2508_p2 = pnand %p2506_p1, %p2815_p3 }
  0x78   : > { %p2513_p11 = por %p2512_p9, %p2511_p5 }
  0x79   : > { %p2509_p12 = pneg %p2508_p2 }
  0x7a   : > { %p2515_p6 = por %p2514_p13, %p2513_p11 }
  0x7c   : > { %p2516_p4 = pnand %p2515_p6, %p2509_p12 }
  0x7e   : > { %2519 = shalt.err (!%p2516_p4)
}
  0x7f   : > { %s2520_s14 = scalar_lea.vmem %s347_s23, 128  ;;  %s2664_s20 = smov [#allocation10]  }
  0x80   : > { %p2521_p7 = scmp.ne.s32.totalorder %s347_s23, %s2520_s14  ;;  %s2525_s12 = sshll.u32 %s2664_s20, 4  ;;  %s2526_s12 = int_to_ptr.vmem [resolvable:$false] %s2525_s12 }
  0x81   : > { %s2527_s28 = scalar_lea.vmem %s2526_s12, 256  ;;  %p2528_p1 = scmp.lt.s32.totalorder %s347_s23, %s2526_s12 }
  0x82   : > { %p2523_p8 = pnand %p2521_p7, %p2815_p3  ;;  %p2529_p2 = scmp.lt.s32.totalorder %s2527_s28, %s2520_s14 }
  0x84   : > { %p2524_p10 = pneg %p2523_p8  ;;  %p2530_p0 = por %p2529_p2, %p2528_p1 }
  0x86   : > { %p2531_p5 = pnand %p2530_p0, %p2524_p10 }
  0x88   : > { %2534 = shalt.err (!%p2531_p5)
}
  0x89   : > { %p3312_p9 = scmp.ne.s32.totalorder %s3302_s30, 0  ;;  %p3313_p12 = scmp.ne.s32.totalorder %s3305_s8, 0 }
  0x8a   : > { %p3314_p11 = scmp.eq.s32.totalorder (!%p3313_p12), %s2739_s27, 0 }
  0x8b   : > { %2332 = dma.hbm_to_vmem [thread:$0]  (!%p3312_p9), %s2917_s13, 128, %s347_s23, %s336_s1  }
  0x8c   : > { %355 = sbr.rel (%p3313_p12) target bundleno = 2052 (0x804), region = 40 }
  0x93   : > { %2616 = dma.done.wait (%p3314_p11), [#allocation5], 1024   ;;  %p3315_p3 = pmov %p3314_p11 }
  0x94   : > { %s366_s7 = sand.u32 1, %s2739_s27   ;;  %s2945_s18 = sand.u32 1, %s2641_s22  }
  0x95   : > { %2618 = vsyncadd (%p3315_p3), [#allocation5], 4294966272  ;;  %s1558_s16 = sshll.u32 %s2945_s18, 7  ;;  %s367_s30 = scalar_lea.sflag [#allocation8], %s366_s7 }
  0x96   : > { %s2948_s2 = scalar_lea.vmem [#allocation7], %s1558_s16  ;;  %p3316_p0 = scmp.ne.s32.totalorder %s3296_s9, 0 }
  0x98   : > { %2620 = dma.done.wait (%p3316_p0), %s367_s30, 4096  }
  0x99   : > { %2622 = vsyncadd (%p3316_p0), %s367_s30, 4294963200  ;;  %s1560_s8 = sshll.u32 %s2945_s18, 3  ;;  %s2955_s13 = scalar_lea.vmem [#allocation9], %s1558_s16 }
  0x9a   : > { %s385_s27 = scalar_lea.sflag [#allocation11], %s2945_s18  ;;  %s2960_s23 = scalar_lea.vmem [#allocation10], %s1560_s8 }
  0x9b   : > { %2624 = dma.done.wait (%p3316_p0), %s385_s27, 128  }
  0x9c   : > { %2626 = vsyncadd (%p3316_p0), %s385_s27, 4294967168  ;;  %v2665_v0 = vmov 0.0|0.0   ;;  %vm2666_vm0 = vmmov 0   ;;  %v2667_v1 = vmov 0.0   ;;  %v467_v2 = vld [vmem:[%s2948_s2] sm:$0xff]  ;;  %v468_v3 = vld [vmem:[%s2948_s2 + $0x8] sm:$0xff] }
  0x9d   : > { %2114 = vmatprep.subr.bf16.mxu1 %v2665_v0  ;;  %1834 = vmatprep.mubr.msk.f32.mxu1 %vm2666_vm0, %v2667_v1  ;;  %v469_v4 = vld [vmem:[%s2948_s2 + $0x10] sm:$0xff]  ;;  %v2082_v5 = vpack.c.bf16 %v468_v3, %v467_v2  ;;  %v470_v6 = vld [vmem:[%s2948_s2 + $0x18] sm:$0xff]  ;;  %v471_v8 = vld [vmem:[%s2948_s2 + $0x20] sm:$0xff]  ;;  %p445_p13 = scmp.lt.s32.totalorder %s2649_s24, 1  ;;  %s1564_s19 = smul.u32 56, %s2649_s24 }
  0x9e   : > { %v2086_v7 = vpack.c.bf16 %v470_v6, %v469_v4  ;;  %v472_v9 = vld [vmem:[%s2948_s2 + $0x28] sm:$0xff]  ;;  %v611_v10 = vld [vmem:[%s2955_s13] sm:$0xff]  ;;  %v613_v14 = vld [vmem:[%s2955_s13 + $0x10] sm:$0xff]  ;;  %s1561_s17 = sshll.u32 %s2945_s18, 6  ;;  %s1565_s12 = smul.u32 40, %s2649_s24 }
  0x9f   : > { %2083 = vmatprep.subr.bf16.mxu0 %v2082_v5  ;;  %v612_v11 = vld [vmem:[%s2955_s13 + $0x8] sm:$0xff]  ;;  %v2090_v12 = vpack.c.bf16 %v472_v9, %v471_v8  ;;  %v614_v15 = vld [vmem:[%s2955_s13 + $0x18] sm:$0xff]  ;;  %v473_v16 = vld [vmem:[%s2948_s2 + $0x30] sm:$0xff]  ;;  %s446_s9 = scalar_select %p445_p13, %s2649_s24, 1 }
  0xa0   : > { %2085 = vmatpush3.bf16.msra.mxu0 %v2082_v5  ;;  %v2977_v13 = vpack.c.bf16 %v612_v11, %v611_v10  ;;  %v474_v17 = vld [vmem:[%s2948_s2 + $0x38] sm:$0xff]  ;;  %v459_v18 = vld [vmem:[#allocation4] sm:$0xff]  ;;  %v2984_v19 = vpack.c.bf16 %v614_v15, %v613_v14  ;;  %v616_v21 = vld [vmem:[%s2955_s13 + $0x28] sm:$0xff]  ;;  %s630_s11 = scalar_lea.vmem [#allocation2], %s1564_s19  ;;  %s3078_s14 = scalar_lea.vmem [#allocation12], %s1561_s17 }
  0xa1   : > { %2087 = vmatprep.subr.bf16.mxu0 %v2086_v7  ;;  %1790 = vmatprep.mubr.f32.mxu0 %v459_v18  ;;  %v615_v20 = vld [vmem:[%s2955_s13 + $0x20] sm:$0xff]  ;;  %v2094_v22 = vpack.c.bf16 %v474_v17, %v473_v16  ;;  %v476_v24 = vld [vmem:[%s2948_s2 + $0x48] sm:$0xff]  ;;  %v617_v26 = vld [vmem:[%s2955_s13 + $0x30] sm:$0xff]  ;;  %s447_s15 = scalar_lea.vmem %s3273_s3, %s446_s9  ;;  %s704_s20 = scalar_lea.vmem %s3078_s14, %s1564_s19 [#allocation12] }
  0xa2   : > { %2116 = vmatpush3.bf16.msra.mxu1 %v2977_v13  ;;  %v475_v23 = vld [vmem:[%s2948_s2 + $0x40] sm:$0xff]  ;;  %v2992_v25 = vpack.c.bf16 %v616_v21, %v615_v20  ;;  %v618_v27 = vld [vmem:[%s2955_s13 + $0x38] sm:$0xff]  ;;  %v477_v29 = vld [vmem:[%s2948_s2 + $0x50] sm:$0xff]  ;;  %s1402_s28 = scalar_lea.vmem [#allocation2], %s1565_s12  ;;  %s1406_s7 = scalar_lea.vmem %s3078_s14, %s1565_s12 [#allocation12] }
  0xa3   : > { %2117 = vmatprep.subr.bf16.mxu1 %v2665_v0  ;;  %v2098_v28 = vpack.c.bf16 %v476_v24, %v475_v23  ;;  %v478_v30 = vld [vmem:[%s2948_s2 + $0x58] sm:$0xff]  ;;  %v3000_v31 = vpack.c.bf16 %v618_v27, %v617_v26  ;;  %v619_v32 = vld [vmem:[%s2955_s13 + $0x40] sm:$0xff]  ;;  %v620_v33 = vld [vmem:[%s2955_s13 + $0x48] sm:$0xff]  ;;  %s1569_s16 = smul.u32 24, %s2649_s24  ;;  %s942_s9 = ssub.s32 4, %s2649_s24 }
  0xa4   : > { %2089 = vmatpush3.bf16.msra.mxu0 %v2086_v7  ;;  %v2102_v34 = vpack.c.bf16 %v478_v30, %v477_v29  ;;  %v479_v35 = vld [vmem:[%s2948_s2 + $0x60] sm:$0xff]  ;;  %v480_v36 = vld [vmem:[%s2948_s2 + $0x68] sm:$0xff]  ;;  %v3008_v37 = vpack.c.bf16 %v620_v33, %v619_v32  ;;  %v621_v38 = vld [vmem:[%s2955_s13 + $0x50] sm:$0xff]  ;;  %s1577_s1 = sshll.u32 %s942_s9, 3  ;;  %s1578_s19 = smul.u32 4294967272, %s2649_s24 }
  0xa5   : > { %2091 = vmatprep.subr.bf16.mxu0 %v2090_v12  ;;  %v622_v39 = vld [vmem:[%s2955_s13 + $0x58] sm:$0xff]  ;;  %v2106_v40 = vpack.c.bf16 %v480_v36, %v479_v35  ;;  %v481_v41 = vld [vmem:[%s2948_s2 + $0x70] sm:$0xff]  ;;  %v623_v44 = vld [vmem:[%s2955_s13 + $0x60] sm:$0xff]  ;;  %s1410_s30 = scalar_lea.vmem [#allocation2], %s1569_s16  ;;  %s944_s29 = scalar_lea.vmem [#allocation2], %s1577_s1 }
  0xa6   : > { %2119 = vmatpush3.bf16.msra.mxu1 %v2984_v19  ;;  %v482_v42 = vld [vmem:[%s2948_s2 + $0x78] sm:$0xff]  ;;  %v3016_v43 = vpack.c.bf16 %v622_v39, %v621_v38  ;;  %v624_v45 = vld [vmem:[%s2955_s13 + $0x68] sm:$0xff]  ;;  %v625_v48 = vld [vmem:[%s2955_s13 + $0x70] sm:$0xff]  ;;  %s1414_s2 = scalar_lea.vmem %s3078_s14, %s1569_s16 [#allocation12]  ;;  %s1432_s17 = scalar_lea.vmem %s3078_s14, %s1578_s19 [#allocation12] }
  0xa7   : > { %2120 = vmatprep.subr.bf16.mxu1 %v2665_v0  ;;  %v2110_v46 = vpack.c.bf16 %v482_v42, %v481_v41  ;;  %v3022_v47 = vpack.c.bf16 %v624_v45, %v623_v44  ;;  %v626_v49 = vld [vmem:[%s2955_s13 + $0x78] sm:$0xff]  ;;  %v460_v51 = vld [vmem:[#allocation4 + $0x8] sm:$0xff]  ;;  %v461_v52 = vld [vmem:[#allocation4 + $0x10] sm:$0xff]  ;;  %s1573_s13 = sshll.u32 %s2649_s24, 3  ;;  %p3317_p4 = scmp.ne.s32.totalorder %s3297_s10, 0 }
  0xa8   : > { %2093 = vmatpush3.bf16.msra.mxu0 %v2090_v12  ;;  %v3028_v50 = vpack.c.bf16 %v626_v49, %v625_v48  ;;  %v457_v53 = vld [vmem:[%s2960_s23] sm:$0xff]  ;;  %v462_v54 = vld [vmem:[#allocation4 + $0x18] sm:$0xff]  ;;  %v465_v57 = vld [vmem:[#allocation4 + $0x30] sm:$0xff]  ;;  %s1417_s27 = scalar_lea.vmem [#allocation2], %s1573_s13  ;;  %s1420_s23 = scalar_lea.vmem %s3078_s14, %s1573_s13 [#allocation12] }
  0xa9   : > { %2095 = vmatprep.subr.bf16.mxu0 %v2094_v22  ;;  %v463_v55 = vld [vmem:[#allocation4 + $0x20] sm:$0xff]  ;;  %v464_v56 = vld [vmem:[#allocation4 + $0x28] sm:$0xff]  ;;  %v466_v58 = vld [vmem:[#allocation4 + $0x38] sm:$0xff] }
  0xaa   : > { %2122 = vmatpush3.bf16.msra.mxu1 %v2992_v25  ;;  %v1563_v59 = vld [vmem:[%s447_s15] ss:$0 sm:$0xff]  ;;  %s1018_s15 = scalar_lea.vmem %s3078_s14, %s1577_s1 [#allocation12]  ;;  %s439_s1 = scalar_lea.vmem [#allocation13], %s1560_s8 }
  0xab   : > { %2123 = vmatprep.subr.bf16.mxu1 %v2665_v0 }
  0xac   : > { %2097 = vmatpush3.bf16.msra.mxu0 %v2094_v22 }
  0xad   : > { %2099 = vmatprep.subr.bf16.mxu0 %v2098_v28 }
  0xae   : > { %2125 = vmatpush3.bf16.msra.mxu1 %v3000_v31 }
  0xaf   : > { %2126 = vmatprep.subr.bf16.mxu1 %v2665_v0 }
  0xb0   : > { %2101 = vmatpush3.bf16.msra.mxu0 %v2098_v28 }
  0xb1   : > { %2103 = vmatprep.subr.bf16.mxu0 %v2102_v34 }
  0xb2   : > { %2128 = vmatpush3.bf16.msra.mxu1 %v3008_v37 }
  0xb3   : > { %2129 = vmatprep.subr.bf16.mxu1 %v2665_v0 }
  0xb4   : > { %2105 = vmatpush3.bf16.msra.mxu0 %v2102_v34 }
  0xb5   : > { %2107 = vmatprep.subr.bf16.mxu0 %v2106_v40 }
  0xb6   : > { %2131 = vmatpush3.bf16.msra.mxu1 %v3016_v43 }
  0xb7   : > { %2132 = vmatprep.subr.bf16.mxu1 %v2665_v0 }
  0xb8   : > { %2109 = vmatpush3.bf16.msra.mxu0 %v2106_v40 }
  0xb9   : > { %2111 = vmatprep.subr.bf16.mxu0 %v2110_v46 }
  0xba   : > { %2134 = vmatpush3.bf16.msra.mxu1 %v3022_v47 }
  0xbb   : > { %2135 = vmatprep.subr.bf16.mxu1 %v2665_v0 }
  0xbc   : > { %2113 = vmatpush3.bf16.msra.mxu0 %v2110_v46 }
  0xbd   : > { %2138 = vmatprep.subr.bf16.mxu0 %v2665_v0 }
  0xbe   : > { %2137 = vmatpush3.bf16.msra.mxu1 %v3028_v50 }
  0xbf   : > { %1791 = vmatmul.mubr.f32.vlgmr.msra.gmra.mrb[0].mxu0 %v460_v51  ;;  %2162 = vmatprep.subr.bf16.mxu1 %v2665_v0 }
  0xc0   : > { %1793 = vmatprep.mubr.f32.mxu0 %v461_v52  ;;  %2140 = vmatpush3.bf16.msra.mxu0 %v2977_v13 }
  0xc1   : > { %2141 = vmatprep.subr.bf16.mxu0 %v2665_v0  ;;  %1835 = vmatmul.mubr.f32.vlgmr.msra.gmra.mrb[0].mxu1 %v457_v53 }
  0xc2   : > { %2164 = vmatpush3.bf16.msra.mxu1 %v2977_v13  ;;  %1904 = vmatprep.mubr.msk.f32.mxu1 %vm2666_vm0, %v2667_v1 }
  0xc3   : > { %1794 = vmatmul.mubr.f32.gmra.mrb[2].mxu0 %v462_v54  ;;  %2165 = vmatprep.subr.bf16.mxu1 %v2665_v0 }
  0xc4   : > { %1796 = vmatprep.mubr.f32.mxu0 %v463_v55  ;;  %2143 = vmatpush3.bf16.msra.mxu0 %v2984_v19 }
  0xc5   : > { %2144 = vmatprep.subr.bf16.mxu0 %v2665_v0 }
  0xc6   : > { %2167 = vmatpush3.bf16.msra.mxu1 %v2984_v19 }
  0xc7   : > { %1797 = vmatmul.mubr.f32.gmra.mrb[4].mxu0 %v464_v56  ;;  %2168 = vmatprep.subr.bf16.mxu1 %v2665_v0 }
  0xc8   : > { %1799 = vmatprep.mubr.f32.mxu0 %v465_v57  ;;  %2146 = vmatpush3.bf16.msra.mxu0 %v2992_v25 }
  0xc9   : > { %2147 = vmatprep.subr.bf16.mxu0 %v2665_v0 }
  0xca   : > { %2170 = vmatpush3.bf16.msra.mxu1 %v2992_v25 }
  0xcb   : > { %1800 = vmatmul.mubr.f32.gmra.mrb[6].mxu0 %v466_v58  ;;  %2171 = vmatprep.subr.bf16.mxu1 %v2665_v0 }
  0xcc   : > { %2149 = vmatpush3.bf16.msra.mxu0 %v3000_v31  ;;  %1869 = vmatprep.mubr.msk.f32.mxu0 %vm2666_vm0, %v2667_v1 }
  0xcd   : > { %2150 = vmatprep.subr.bf16.mxu0 %v2665_v0 }
  0xce   : > { %2173 = vmatpush3.bf16.msra.mxu1 %v3000_v31 }
  0xcf   : > { %2174 = vmatprep.subr.bf16.mxu1 %v2665_v0 }
  0xd0   : > { %2152 = vmatpush3.bf16.msra.mxu0 %v3008_v37 }
  0xd1   : > { %2153 = vmatprep.subr.bf16.mxu0 %v2665_v0 }
  0xd2   : > { %2176 = vmatpush3.bf16.msra.mxu1 %v3008_v37 }
  0xd3   : > { %2177 = vmatprep.subr.bf16.mxu1 %v2665_v0 }
  0xd4   : > { %2155 = vmatpush3.bf16.msra.mxu0 %v3016_v43 }
  0xd5   : > { %2156 = vmatprep.subr.bf16.mxu0 %v2665_v0 }
  0xd6   : > { %2179 = vmatpush3.bf16.msra.mxu1 %v3016_v43 }
  0xd7   : > { %2180 = vmatprep.subr.bf16.mxu1 %v2665_v0 }
  0xd8   : > { %2158 = vmatpush3.bf16.msra.mxu0 %v3022_v47 }
  0xd9   : > { %2159 = vmatprep.subr.bf16.mxu0 %v2665_v0 }
  0xda   : > { %2182 = vmatpush3.bf16.msra.mxu1 %v3022_v47 }
  0xdb   : > { %2183 = vmatprep.subr.bf16.mxu1 %v2665_v0 }
  0xdc   : > { %2161 = vmatpush3.bf16.msra.mxu0 %v3028_v50 }
  0xdd   : > { %2186 = vmatprep.subr.bf16.mxu0 %v2665_v0 }
  0xde   : > { %2185 = vmatpush3.bf16.msra.mxu1 %v3028_v50 }
  0xdf   : > { %2210 = vmatprep.subr.bf16.mxu1 %v2665_v0 }
 0x192   : > { %v1792_v60 = vpop.f32.mrb[0].mxu0 }
 0x193   : > { %v596_v61 = vadd.f32 %v1792_v60, %v1563_v59  ;;  %v549_v62 = vpop.f32.mrb[1].mxu0 }
 0x194   : > { %v595_v63 = vadd.f32 %v1563_v59, %v549_v62  ;;  %v698_v2 = vpop.f32.mrb[0].mxu1 }
 0x195   : > { %604 = vst [vmem:[#allocation2 + $0x8] sm:$0xff] %v596_v61  ;;  %v1836_v4 = vpop.f32.mrb[1].mxu1 }
 0x196   : > { %603 = vst [vmem:[#allocation2] sm:$0xff] %v595_v63  ;;  %v1795_v3 = vpop.f32.mrb[2].mxu0 }
 0x197   : > { %v598_v5 = vadd.f32 %v1795_v3, %v1563_v59  ;;  %v559_v6 = vpop.f32.mrb[3].mxu0 }
 0x198   : > { %v597_v7 = vadd.f32 %v1563_v59, %v559_v6 }
 0x199   : > { %606 = vst [vmem:[#allocation2 + $0x18] sm:$0xff] %v598_v5 }
 0x19a   : > { %605 = vst [vmem:[#allocation2 + $0x10] sm:$0xff] %v597_v7  ;;  %v1798_v8 = vpop.f32.mrb[4].mxu0 }
 0x19b   : > { %v600_v9 = vadd.f32 %v1798_v8, %v1563_v59  ;;  %v569_v10 = vpop.f32.mrb[5].mxu0 }
 0x19c   : > { %v599_v11 = vadd.f32 %v1563_v59, %v569_v10 }
 0x19d   : > { %608 = vst [vmem:[#allocation2 + $0x28] sm:$0xff] %v600_v9 }
 0x19e   : > { %607 = vst [vmem:[#allocation2 + $0x20] sm:$0xff] %v599_v11  ;;  %v1801_v12 = vpop.f32.mrb[6].mxu0 }
 0x19f   : > { %v602_v14 = vadd.f32 %v1801_v12, %v1563_v59  ;;  %v579_v15 = vpop.f32.mrb[7].mxu0 }
 0x1a0   : > { %v601_v16 = vadd.f32 %v1563_v59, %v579_v15 }
 0x1a1   : > { %610 = vst [vmem:[#allocation2 + $0x38] sm:$0xff] %v602_v14 }
 0x1a2   : > { %609 = vst [vmem:[#allocation2 + $0x30] sm:$0xff] %v601_v16 }
 0x1a9   : > { %v631_v17 = vld [vmem:[%s630_s11] sm:$0xff]  ;;  %v1566_v21 = vld [vmem:[%s1402_s28 + $0x8] sm:$0xff]  ;;  %v1570_v27 = vld [vmem:[%s1410_s30 + $0x10] sm:$0xff]  ;;  %s1428_s11 = scalar_lea.vmem [#allocation2], %s1578_s19  ;;  %s1592_s30 = sshll.u32 %s2649_s24, 7 }
 0x1aa   : > { %v702_v18 = vadd.f32 %v698_v2, %v631_v17  ;;  %v1574_v33 = vld [vmem:[%s1417_s27 + $0x18] sm:$0xff]  ;;  %v945_v39 = vld [vmem:[%s944_s29] sm:$0xff]  ;;  %s3188_s9 = scalar_lea.hbm %s3275_s5, %s1592_s30  ;;  %s1300_s29 = sshll.u32 %s439_s1, 4  ;;  %s3199_s29 = int_to_ptr.vmem [resolvable:$true] %s1300_s29 }
 0x1ac   : > { %2401 = vtanh.f32 %v702_v18 }
 0x1b6   : > { %v2402_v20 = vpop.eup %2401 }
 0x1b7   : > { %705 = vst [vmem:[%s704_s20] sm:$0xff] %v2402_v20  ;;  %1870 = vmatmul.mubr.f32.vlgmr.msra.gmra.mrb[8].mxu0 %v2402_v20  ;;  %s1582_s20 = smul.u32 4294967256, %s2649_s24 }
 0x1b8   : > { %2188 = vmatpush3.bf16.msra.mxu0 %v2977_v13  ;;  %1939 = vmatprep.mubr.msk.f32.mxu0 %vm2666_vm0, %v2667_v1 }
 0x1b9   : > { %2189 = vmatprep.subr.bf16.mxu0 %v2665_v0  ;;  %s1436_s12 = scalar_lea.vmem [#allocation2], %s1582_s20  ;;  %s1440_s28 = scalar_lea.vmem %s3078_s14, %s1582_s20 [#allocation12] }
 0x1bc   : > { %2191 = vmatpush3.bf16.msra.mxu0 %v2984_v19 }
 0x1bd   : > { %2192 = vmatprep.subr.bf16.mxu0 %v2665_v0 }
 0x1c0   : > { %2194 = vmatpush3.bf16.msra.mxu0 %v2992_v25 }
 0x1c1   : > { %2195 = vmatprep.subr.bf16.mxu0 %v2665_v0 }
 0x1c4   : > { %2197 = vmatpush3.bf16.msra.mxu0 %v3000_v31 }
 0x1c5   : > { %2198 = vmatprep.subr.bf16.mxu0 %v2665_v0 }
 0x1c8   : > { %2200 = vmatpush3.bf16.msra.mxu0 %v3008_v37 }
 0x1c9   : > { %2201 = vmatprep.subr.bf16.mxu0 %v2665_v0 }
 0x1cc   : > { %2203 = vmatpush3.bf16.msra.mxu0 %v3016_v43 }
 0x1cd   : > { %2204 = vmatprep.subr.bf16.mxu0 %v2665_v0 }
 0x1d0   : > { %2206 = vmatpush3.bf16.msra.mxu0 %v3022_v47 }
 0x1d1   : > { %2207 = vmatprep.subr.bf16.mxu0 %v2665_v0 }
 0x1d4   : > { %2209 = vmatpush3.bf16.msra.mxu0 %v3028_v50 }
 0x1d5   : > { %2234 = vmatprep.subr.bf16.mxu0 %v2665_v0 }
 0x28a   : > { %v777_v22 = vpop.f32.mrb[8].mxu0 }
 0x28b   : > { %v781_v23 = vadd.f32 %v1566_v21, %v777_v22  ;;  %v1871_v24 = vpop.f32.mrb[9].mxu0 }
 0x28d   : > { %2403 = vtanh.f32 %v781_v23 }
 0x297   : > { %v2404_v26 = vpop.eup %2403 }
 0x298   : > { %1568 = vst [vmem:[%s1406_s7 + $0x8] sm:$0xff] %v2404_v26  ;;  %1905 = vmatmul.mubr.f32.vlgmr.msra.gmra.mrb[2].mxu1 %v2404_v26  ;;  %s1586_s7 = smul.u32 4294967240, %s2649_s24  ;;  %s3197_s24 = scalar_lea.hbm %s3276_s6, %s1592_s30 }
 0x299   : > { %2212 = vmatpush3.bf16.msra.mxu1 %v2977_v13  ;;  %1974 = vmatprep.mubr.msk.f32.mxu1 %vm2666_vm0, %v2667_v1 }
 0x29a   : > { %2213 = vmatprep.subr.bf16.mxu1 %v2665_v0  ;;  %s1444_s16 = scalar_lea.vmem [#allocation2], %s1586_s7  ;;  %s1448_s13 = scalar_lea.vmem %s3078_s14, %s1586_s7 [#allocation12] }
 0x29d   : > { %2215 = vmatpush3.bf16.msra.mxu1 %v2984_v19 }
 0x29e   : > { %2216 = vmatprep.subr.bf16.mxu1 %v2665_v0 }
 0x2a1   : > { %2218 = vmatpush3.bf16.msra.mxu1 %v2992_v25 }
 0x2a2   : > { %2219 = vmatprep.subr.bf16.mxu1 %v2665_v0 }
 0x2a5   : > { %2221 = vmatpush3.bf16.msra.mxu1 %v3000_v31 }
 0x2a6   : > { %2222 = vmatprep.subr.bf16.mxu1 %v2665_v0 }
 0x2a9   : > { %2224 = vmatpush3.bf16.msra.mxu1 %v3008_v37 }
 0x2aa   : > { %2225 = vmatprep.subr.bf16.mxu1 %v2665_v0 }
 0x2ad   : > { %2227 = vmatpush3.bf16.msra.mxu1 %v3016_v43 }
 0x2ae   : > { %2228 = vmatprep.subr.bf16.mxu1 %v2665_v0 }
 0x2b1   : > { %2230 = vmatpush3.bf16.msra.mxu1 %v3022_v47 }
 0x2b2   : > { %2231 = vmatprep.subr.bf16.mxu1 %v2665_v0 }
 0x2b5   : > { %2233 = vmatpush3.bf16.msra.mxu1 %v3028_v50 }
 0x2b6   : > { %2258 = vmatprep.subr.bf16.mxu1 %v2665_v0 }
 0x36b   : > { %v856_v28 = vpop.f32.mrb[2].mxu1 }
 0x36c   : > { %v860_v29 = vadd.f32 %v1570_v27, %v856_v28  ;;  %v1906_v30 = vpop.f32.mrb[3].mxu1 }
 0x36e   : > { %2405 = vtanh.f32 %v860_v29 }
 0x378   : > { %v2406_v32 = vpop.eup %2405 }
 0x379   : > { %1572 = vst [vmem:[%s1414_s2 + $0x10] sm:$0xff] %v2406_v32  ;;  %1940 = vmatmul.mubr.f32.vlgmr.msra.gmra.mrb[10].mxu0 %v2406_v32  ;;  %s1284_s2 = sshll.u32 %s3078_s14, 4  ;;  %s1260_s14 = scalar_lea.sflag [#allocation6], %s2945_s18  ;;  %s3190_s2 = int_to_ptr.vmem [resolvable:$true] %s1284_s2 }
 0x37a   : > { %2236 = vmatpush3.bf16.msra.mxu0 %v2977_v13  ;;  %2009 = vmatprep.mubr.msk.f32.mxu0 %vm2666_vm0, %v2667_v1 }
 0x37b   : > { %2237 = vmatprep.subr.bf16.mxu0 %v2665_v0 }
 0x37e   : > { %2239 = vmatpush3.bf16.msra.mxu0 %v2984_v19 }
 0x37f   : > { %2240 = vmatprep.subr.bf16.mxu0 %v2665_v0 }
 0x382   : > { %2242 = vmatpush3.bf16.msra.mxu0 %v2992_v25 }
 0x383   : > { %2243 = vmatprep.subr.bf16.mxu0 %v2665_v0 }
 0x386   : > { %2245 = vmatpush3.bf16.msra.mxu0 %v3000_v31 }
 0x387   : > { %2246 = vmatprep.subr.bf16.mxu0 %v2665_v0 }
 0x38a   : > { %2248 = vmatpush3.bf16.msra.mxu0 %v3008_v37 }
 0x38b   : > { %2249 = vmatprep.subr.bf16.mxu0 %v2665_v0 }
 0x38e   : > { %2251 = vmatpush3.bf16.msra.mxu0 %v3016_v43 }
 0x38f   : > { %2252 = vmatprep.subr.bf16.mxu0 %v2665_v0 }
 0x392   : > { %2254 = vmatpush3.bf16.msra.mxu0 %v3022_v47 }
 0x393   : > { %2255 = vmatprep.subr.bf16.mxu0 %v2665_v0 }
 0x396   : > { %2257 = vmatpush3.bf16.msra.mxu0 %v3028_v50 }
 0x397   : > { %2282 = vmatprep.subr.bf16.mxu0 %v2665_v0 }
 0x44c   : > { %v934_v34 = vpop.f32.mrb[10].mxu0 }
 0x44d   : > { %v938_v35 = vadd.f32 %v1574_v33, %v934_v34  ;;  %v1941_v36 = vpop.f32.mrb[11].mxu0 }
 0x44f   : > { %2407 = vtanh.f32 %v938_v35 }
 0x459   : > { %v2408_v38 = vpop.eup %2407 }
 0x45a   : > { %1576 = vst [vmem:[%s1420_s23 + $0x18] sm:$0xff] %v2408_v38  ;;  %1975 = vmatmul.mubr.f32.vlgmr.msra.gmra.mrb[4].mxu1 %v2408_v38 }
 0x45b   : > { %2260 = vmatpush3.bf16.msra.mxu1 %v2977_v13  ;;  %2044 = vmatprep.mubr.msk.f32.mxu1 %vm2666_vm0, %v2667_v1 }
 0x45c   : > { %2261 = vmatprep.subr.bf16.mxu1 %v2665_v0 }
 0x45f   : > { %2263 = vmatpush3.bf16.msra.mxu1 %v2984_v19 }
 0x460   : > { %2264 = vmatprep.subr.bf16.mxu1 %v2665_v0 }
 0x463   : > { %2266 = vmatpush3.bf16.msra.mxu1 %v2992_v25 }
 0x464   : > { %2267 = vmatprep.subr.bf16.mxu1 %v2665_v0 }
 0x467   : > { %2269 = vmatpush3.bf16.msra.mxu1 %v3000_v31 }
 0x468   : > { %2270 = vmatprep.subr.bf16.mxu1 %v2665_v0 }
 0x46b   : > { %2272 = vmatpush3.bf16.msra.mxu1 %v3008_v37 }
 0x46c   : > { %2273 = vmatprep.subr.bf16.mxu1 %v2665_v0 }
 0x46f   : > { %2275 = vmatpush3.bf16.msra.mxu1 %v3016_v43 }
 0x470   : > { %2276 = vmatprep.subr.bf16.mxu1 %v2665_v0 }
 0x473   : > { %2278 = vmatpush3.bf16.msra.mxu1 %v3022_v47 }
 0x474   : > { %2279 = vmatprep.subr.bf16.mxu1 %v2665_v0 }
 0x477   : > { %2281 = vmatpush3.bf16.msra.mxu1 %v3028_v50 }
 0x52d   : > { %v1012_v40 = vpop.f32.mrb[4].mxu1 }
 0x52e   : > { %v1016_v41 = vadd.f32 %v1012_v40, %v945_v39  ;;  %v1976_v42 = vpop.f32.mrb[5].mxu1 }
 0x530   : > { %2409 = vtanh.f32 %v1016_v41 }
 0x53a   : > { %v2410_v44 = vpop.eup %2409 }
 0x53b   : > { %1019 = vst [vmem:[%s1018_s15] sm:$0xff] %v2410_v44  ;;  %2010 = vmatmul.mubr.f32.vlgmr.msra.gmra.mrb[12].mxu0 %v2410_v44 }
 0x53c   : > { %2284 = vmatpush3.bf16.msra.mxu0 %v2977_v13  ;;  %2079 = vmatprep.mubr.msk.f32.mxu0 %vm2666_vm0, %v2667_v1  ;;  %v1579_v1 = vld [vmem:[%s1428_s11 + $0x28] sm:$0xff]  ;;  %s2535_s11 = scalar_lea.vmem %s3190_s2, 1024 }
 0x53d   : > { %2285 = vmatprep.subr.bf16.mxu0 %v2665_v0  ;;  %p2536_p6 = scmp.ne.s32.totalorder %s3190_s2, %s2535_s11 }
 0x53f   : > { %p2537_p7 = pnand %p2536_p6, %p3317_p4 }
 0x540   : > { %2287 = vmatpush3.bf16.msra.mxu0 %v2984_v19 }
 0x541   : > { %2288 = vmatprep.subr.bf16.mxu0 %v2665_v0  ;;  %p2538_p8 = pneg %p2537_p7 }
 0x544   : > { %2290 = vmatpush3.bf16.msra.mxu0 %v2992_v25 }
 0x545   : > { %2291 = vmatprep.subr.bf16.mxu0 %v2665_v0 }
 0x548   : > { %2293 = vmatpush3.bf16.msra.mxu0 %v3000_v31 }
 0x549   : > { %2294 = vmatprep.subr.bf16.mxu0 %v2665_v0 }
 0x54c   : > { %2296 = vmatpush3.bf16.msra.mxu0 %v3008_v37  ;;  %v1583_v37 = vld [vmem:[%s1436_s12 + $0x30] sm:$0xff] }
 0x54d   : > { %2297 = vmatprep.subr.bf16.mxu0 %v2665_v0 }
 0x550   : > { %2299 = vmatpush3.bf16.msra.mxu0 %v3016_v43 }
 0x551   : > { %2300 = vmatprep.subr.bf16.mxu0 %v2665_v0 }
 0x554   : > { %2302 = vmatpush3.bf16.msra.mxu0 %v3022_v47  ;;  %v1587_v47 = vld [vmem:[%s1444_s16 + $0x38] sm:$0xff] }
 0x555   : > { %2303 = vmatprep.subr.bf16.mxu0 %v2665_v0 }
 0x558   : > { %2305 = vmatpush3.bf16.msra.mxu0 %v3028_v50 }
 0x60e   : > { %v1091_v13 = vpop.f32.mrb[12].mxu0 }
 0x60f   : > { %v1095_v19 = vadd.f32 %v1579_v1, %v1091_v13  ;;  %v2011_v25 = vpop.f32.mrb[13].mxu0 }
 0x611   : > { %2411 = vtanh.f32 %v1095_v19 }
 0x61b   : > { %v2412_v31 = vpop.eup %2411 }
 0x61c   : > { %1581 = vst [vmem:[%s1432_s17 + $0x28] sm:$0xff] %v2412_v31  ;;  %2045 = vmatmul.mubr.f32.vlgmr.msra.gmra.mrb[6].mxu1 %v2412_v31  ;;  %s2668_s17 = smov [#allocation12]  }
 0x61d   : > { %s2539_s8 = sshll.u32 %s2668_s17, 4  ;;  %s2540_s8 = int_to_ptr.vmem [resolvable:$false] %s2539_s8 }
 0x61e   : > { %s2541_s20 = scalar_lea.vmem %s2540_s8, 2048  ;;  %p2542_p10 = scmp.lt.s32.totalorder %s3190_s2, %s2540_s8 }
 0x61f   : > { %p2543_p1 = scmp.lt.s32.totalorder %s2541_s20, %s2535_s11 }
 0x621   : > { %p2544_p2 = por %p2543_p1, %p2542_p10 }
 0x623   : > { %p2545_p5 = pnand %p2544_p2, %p2538_p8 }
 0x6ef   : > { %v1170_v0 = vpop.f32.mrb[6].mxu1 }
 0x6f0   : > { %v1174_v43 = vadd.f32 %v1583_v37, %v1170_v0  ;;  %v2046_v45 = vpop.f32.mrb[7].mxu1 }
 0x6f2   : > { %2413 = vtanh.f32 %v1174_v43 }
 0x6fc   : > { %v2414_v46 = vpop.eup %2413 }
 0x6fd   : > { %1585 = vst [vmem:[%s1440_s28 + $0x30] sm:$0xff] %v2414_v46  ;;  %2080 = vmatmul.mubr.f32.vlgmr.msra.gmra.mrb[14].mxu0 %v2414_v46 }
 0x7d0   : > { %v1249_v48 = vpop.f32.mrb[14].mxu0 }
 0x7d1   : > { %v1253_v49 = vadd.f32 %v1587_v47, %v1249_v48  ;;  %v2081_v50 = vpop.f32.mrb[15].mxu0 }
 0x7d3   : > { %2415 = vtanh.f32 %v1253_v49 }
 0x7dd   : > { %v2416_v51 = vpop.eup %2415 }
 0x7de   : > { %1589 = vst [vmem:[%s1448_s13 + $0x38] sm:$0xff] %v2416_v51  ;;  %1258 = vst [vmem:[%s439_s1] sm:$0xff] %v2416_v51 }
 0x7df   : > { %2548 = shalt.err (!%p2545_p5)
}
 0x7e0   : > { %s2549_s12 = scalar_lea.hbm %s3188_s9, 1024  ;;  %s2553_s16 = scalar_lea.hbm %s3275_s5, 2048 }
 0x7e1   : > { %p2550_p9 = scmp.ne.s32.totalorder %s3188_s9, %s2549_s12  ;;  %p2554_p3 = scmp.lt.u32.totalorder %s3188_s9, %s3275_s5 }
 0x7e2   : > { %p2555_p0 = scmp.lt.u32.totalorder %s2553_s16, %s2549_s12  ;;  %p2557_p6 = scmp.lt.u32.totalorder %s2549_s12, %s3188_s9 }
 0x7e3   : > { %p2551_p12 = pnand %p2550_p9, %p3317_p4 }
 0x7e4   : > { %p2556_p13 = por %p2555_p0, %p2554_p3 }
 0x7e5   : > { %p2552_p11 = pneg %p2551_p12 }
 0x7e6   : > { %p2558_p7 = por %p2557_p6, %p2556_p13 }
 0x7e8   : > { %p2559_p8 = pnand %p2558_p7, %p2552_p11 }
 0x7ea   : > { %2562 = shalt.err (!%p2559_p8)
}
 0x7eb   : > { %s2669_s27 = smov 128   ;;  %s2670_s23 = smov 256  }
 0x7ec   : > { %s2671_s1 = smov 8   ;;  %s1265_s15 = scalar_lea.sflag [#allocation14], %s2945_s18 }
 0x7ed   : > { %2316 = dma.vmem_to_hbm [thread:$0]  (%p3317_p4), %s3190_s2, 1024, %s3188_s9, %s1260_s14, %s2669_s27, %s2670_s23, %s2671_s1  }
 0x7ee   : > { %s2563_s19 = scalar_lea.vmem %s3199_s29, 128  ;;  %s2672_s11 = smov [#allocation13]  }
 0x7ef   : > { %p2564_p10 = scmp.ne.s32.totalorder %s3199_s29, %s2563_s19  ;;  %s2567_s17 = sshll.u32 %s2672_s11, 4  ;;  %s2568_s17 = int_to_ptr.vmem [resolvable:$false] %s2567_s17 }
 0x7f0   : > { %s2569_s8 = scalar_lea.vmem %s2568_s17, 256  ;;  %p2570_p5 = scmp.lt.s32.totalorder %s3199_s29, %s2568_s17 }
 0x7f1   : > { %p2565_p1 = pnand %p2564_p10, %p3317_p4  ;;  %p2571_p9 = scmp.lt.s32.totalorder %s2569_s8, %s2563_s19 }
 0x7f3   : > { %p2566_p2 = pneg %p2565_p1  ;;  %p2572_p12 = por %p2571_p9, %p2570_p5 }
 0x7f5   : > { %p2573_p11 = pnand %p2572_p12, %p2566_p2 }
 0x7f7   : > { %2576 = shalt.err (!%p2573_p11)
}
 0x7f8   : > { %s2577_s18 = scalar_lea.hbm %s3197_s24, 128  ;;  %s2581_s14 = scalar_lea.hbm %s3276_s6, 256 }
 0x7f9   : > { %p2578_p3 = scmp.ne.s32.totalorder %s3197_s24, %s2577_s18  ;;  %p2582_p6 = scmp.lt.u32.totalorder %s3197_s24, %s3276_s6 }
 0x7fa   : > { %p2583_p7 = scmp.lt.u32.totalorder %s2581_s14, %s2577_s18  ;;  %p2585_p10 = scmp.lt.u32.totalorder %s2577_s18, %s3197_s24 }
 0x7fb   : > { %p2579_p0 = pnand %p2578_p3, %p3317_p4 }
 0x7fc   : > { %p2584_p8 = por %p2583_p7, %p2582_p6 }
 0x7fd   : > { %p2580_p13 = pneg %p2579_p0 }
 0x7fe   : > { %p2586_p1 = por %p2585_p10, %p2584_p8 }
 0x800   : > { %p2587_p2 = pnand %p2586_p1, %p2580_p13 }
 0x802   : > { %2590 = shalt.err (!%p2587_p2)
}
 0x803   : > { %2317 = dma.vmem_to_hbm [thread:$0]  (%p3317_p4), %s3199_s29, 128, %s3197_s24, %s1265_s15  }
 0x804 PF: > { %s3318_s28 = sld [smem:[#allocation23_spill]]  ;;  %s1312_s7 = sand.u32 1, %s2637_s21  }
 0x805   : > { %p3320_p9 = scmp.ge.s32.totalorder %s2657_s26, 2  ;;  %s1313_s16 = scalar_lea.sflag [#allocation6], %s1312_s7 }
 0x80a   : > { %p3319_p5 = scmp.ne.s32.totalorder %s3318_s28, 0 }
 0x80c   : > { %p2334_p12 = pnand %p3320_p9, %p3319_p5 }
 0x80e   : > { %2628 = dma.done.wait (!%p2334_p12), %s1313_s16, 1024  }
 0x80f   : > { %2630 = vsyncadd (!%p2334_p12), %s1313_s16, 4294966272  ;;  %s1322_s30 = scalar_lea.sflag [#allocation14], %s1312_s7 }
 0x810   : > { %2632 = dma.done.wait (!%p2334_p12), %s1322_s30, 128  }
 0x811   : > { %2634 = vsyncadd (!%p2334_p12), %s1322_s30, 4294967168  ;;  %s32_s26 = sadd.s32 1, %s2657_s26   ;;  %s3321_s10 = sld [smem:[#allocation20_spill]] }
 0x812   : > { %p29_p11 = scmp.ge.s32.totalorder %s32_s26, 4   ;;  %s3322_s23 = sld [smem:[#allocation22_spill]] }
 0x813   : > { %s3323_s29 = sld [smem:[#allocation21_spill]]  ;;  %s3324_s21 = smov %s2641_s22 }
 0x814   : > { %s3326_s24 = smov %s2653_s25  ;;  %31 = sbr.rel (!%p29_p11) target bundleno = 15 (0xf), region = 162 }
 0x817   : > { %s3325_s22 = smov %s3321_s10 }
 0x819   : > { %s3327_s25 = smov %s3323_s29 }
 0x81b   :  { %1327 = vsyncpa [#allocation5], 1 }
 0x81c   :  { %1329 = vsyncpa [#allocation5 + $0x1], 1 }
 0x81d   :  { %1330 = vsyncpa [#allocation8], 1 }
 0x81e   :  { %1332 = vsyncpa [#allocation8 + $0x1], 1 }
 0x81f   :  { %1333 = vsyncpa [#allocation11], 1 }
 0x820   :  { %1335 = vsyncpa [#allocation11 + $0x1], 1 }
 0x821   :  { %1336 = vsyncpa [#allocation6], 1 }
 0x822   :  { %1338 = vsyncpa [#allocation6 + $0x1], 1 }
 0x823   :  { %1339 = vsyncpa [#allocation14], 1 }
 0x824   :  { %1341 = vsyncpa [#allocation14 + $0x1], 1 }

</bundles_post_ra>
